<compile_context>
chip_gen: v7x
topology: tpu7x:2x2x1
jax: 0.10.0
libtpu: 0.0.40
codegen_flags: <defaults>
</compile_context>

<pallas_src>
import functools

import jax
import jax.numpy as jnp
import numpy as np
from jax.experimental import pallas as pl
from jax.experimental.pallas import tpu as pltpu

BN_EPS = 1e-5
ROW_TILE = 1024        # packed (., 128) rows per block for pointwise kernels
CONV_ROW_TILE = 64     # output image rows per conv grid step (must divide h, %8==0)


# --------------------------------------------------------------------------
# Pallas kernels
# --------------------------------------------------------------------------
def _channel_mlp_kernel(x_ref, w1_ref, b1_ref, w2_ref, b2_ref, y_ref):
    # per-pixel channel MLP (block-diagonal weights over 128-lane packed rows),
    # fused with the x * att elementwise product.  No sigmoid on this branch.
    x = x_ref[...]
    h1 = jnp.maximum(
        jnp.dot(x, w1_ref[...], preferred_element_type=jnp.float32) + b1_ref[...], 0.0)
    att = jnp.dot(h1, w2_ref[...], preferred_element_type=jnp.float32) + b2_ref[...]
    y_ref[...] = x * att


def _conv7_kernel(a_ref, hb_ref, w_ref, brow_ref, sc_ref, sh_ref,
                  z_ref, ssum_ref, ssq_ref, *, tr, h, fuse_bn_relu):
    # a_ref : (tr, Lin)  padded-image rows [t*tr, (t+1)*tr) of the current image
    # hb_ref: (8, Lin)   rows [(t+1)*tr, (t+1)*tr + 8)   (bottom halo, first 6 used)
    x = jnp.concatenate([a_ref[...], hb_ref[0:6, :]], axis=0)        # (tr + 6, Lin)
    if fuse_bn_relu:
        # fused BatchNorm1 + ReLU applied to conv2's input as it is consumed.
        # Halo rows/cols of the zero-padded input must stay exactly zero
        # (ReLU(shift) != 0), so mask on the global padded-row index.
        t = pl.program_id(1)
        r = t * tr + jax.lax.broadcasted_iota(jnp.int32, (tr + 6, 1), 0)
        interior = jnp.logical_and(r >= 3, r < 3 + h)
        x = jnp.where(interior,
                      jnp.maximum(x * sc_ref[...] + sh_ref[...], 0.0),
                      0.0)
    lout = w_ref.shape[-1]
    acc = jnp.zeros((tr, lout), jnp.float32) + brow_ref[...]
    # 7 MXU matmuls; the 7 horizontal taps are folded into the banded weights,
    # the 7 vertical taps are contiguous row offsets of the halo block.
    for dy in range(7):
        acc = acc + jnp.dot(x[dy:dy + tr, :], w_ref[dy],
                            preferred_element_type=jnp.float32)
    z_ref[...] = acc
    # per-tile BatchNorm partial statistics, straight from the accumulator
    ssum_ref[0] = jnp.sum(acc, axis=0, keepdims=True)
    ssq_ref[0] = jnp.sum(acc * acc, axis=0, keepdims=True)


def _bn_sigmoid_mul_kernel(z_ref, sc_ref, sh_ref, y_ref, o_ref):
    o_ref[...] = y_ref[...] * jax.nn.sigmoid(z_ref[...] * sc_ref[...] + sh_ref[...])


# --------------------------------------------------------------------------
# pallas_call plumbing
# --------------------------------------------------------------------------
def _const_spec(shape):
    nd = len(shape)
    return pl.BlockSpec(shape, lambda *args, _nd=nd: (0,) * _nd)


def _channel_attention(x_pk, w1bd, b1t, w2bd, b2t, tm):
    rows, lanes = x_pk.shape
    return pl.pallas_call(
        _channel_mlp_kernel,
        out_shape=jax.ShapeDtypeStruct((rows, lanes), jnp.float32),
        grid=(pl.cdiv(rows, tm),),
        in_specs=[pl.BlockSpec((tm, lanes), lambda i: (i, 0)),
                  _const_spec(w1bd.shape), _const_spec(b1t.shape),
                  _const_spec(w2bd.shape), _const_spec(b2t.shape)],
        out_specs=pl.BlockSpec((tm, lanes), lambda i: (i, 0)),
        compiler_params=pltpu.CompilerParams(dimension_semantics=("parallel",)),
    )(x_pk, w1bd, b1t, w2bd, b2t)


def _conv7(x_pad, w_banded, brow, sc_row, sh_row, *, b, h, tr, fuse_bn_relu):
    rtot, lin = x_pad.shape                 # rtot = b * (h + tr)
    lout = w_banded.shape[-1]
    nt = h // tr
    rpi = h + tr                            # padded rows per image
    kernel = functools.partial(_conv7_kernel, tr=tr, h=h, fuse_bn_relu=fuse_bn_relu)
    return pl.pallas_call(
        kernel,
        out_shape=(jax.ShapeDtypeStruct((b * h, lout), jnp.float32),
                   jax.ShapeDtypeStruct((b * nt, 1, lout), jnp.float32),
                   jax.ShapeDtypeStruct((b * nt, 1, lout), jnp.float32)),
        grid=(b, nt),
        in_specs=[
            # main row tile and 8-row bottom halo of the SAME array (overlap via
            # a second operand -> no manual DMA, auto double-buffering)
            pl.BlockSpec((tr, lin), lambda bi, t: (bi * (rpi // tr) + t, 0)),
            pl.BlockSpec((8, lin),
                         lambda bi, t: (bi * (rpi // 8) + (t + 1) * (tr // 8), 0)),
            _const_spec(w_banded.shape), _const_spec(brow.shape),
            _const_spec(sc_row.shape), _const_spec(sh_row.shape)],
        out_specs=(pl.BlockSpec((tr, lout), lambda bi, t: (bi * (h // tr) + t, 0)),
                   pl.BlockSpec((1, 1, lout), lambda bi, t: (bi * nt + t, 0, 0)),
                   pl.BlockSpec((1, 1, lout), lambda bi, t: (bi * nt + t, 0, 0))),
        compiler_params=pltpu.CompilerParams(
            dimension_semantics=("parallel", "parallel"),
            vmem_limit_bytes=48 * 1024 * 1024),
    )(x_pad, x_pad, w_banded, brow, sc_row, sh_row)


def _bn_sigmoid_mul(z_pk, sc_t, sh_t, y_pk, tm):
    rows, lanes = y_pk.shape
    return pl.pallas_call(
        _bn_sigmoid_mul_kernel,
        out_shape=jax.ShapeDtypeStruct((rows, lanes), jnp.float32),
        grid=(pl.cdiv(rows, tm),),
        in_specs=[pl.BlockSpec((tm, lanes), lambda i: (i, 0)),
                  _const_spec(sc_t.shape), _const_spec(sh_t.shape),
                  pl.BlockSpec((tm, lanes), lambda i: (i, 0))],
        out_specs=pl.BlockSpec((tm, lanes), lambda i: (i, 0)),
        input_output_aliases={3: 0},   # alias y into the output buffer
        compiler_params=pltpu.CompilerParams(dimension_semantics=("parallel",)),
    )(z_pk, sc_t, sh_t, y_pk)


# --------------------------------------------------------------------------
# Trace-time parameter repacking / layout glue (plain JAX / numpy)
# --------------------------------------------------------------------------
def _pad_width_for(ch, w):
    """Smallest width >= w+6 whose packed lane count width*ch is a 128-multiple."""
    wp = w + 6
    if 128 % ch == 0:
        per = 128 // ch
        wp = ((wp + per - 1) // per) * per
    return wp


def _block_diag(w, p):
    """(a,b) -> (p*a, p*b) block-diagonal with p copies (per-pixel MLP on packed rows)."""
    a, bb = w.shape
    eye = jnp.eye(p, dtype=w.dtype)
    return (eye[:, None, :, None] * w[None, :, None, :]).reshape(p * a, p * bb)


def _banded_conv_weight(wk, w, w_in_pad, w_out_pad, out_off):
    """HWIO (7,7,cin,cout) -> (7, w_in_pad*cin, w_out_pad*cout) banded matrices.

    BW[dy, u*cin+i, v*cout+j] = wk[dy, u-v+out_off, i, j] when output column v is an
    interior pixel and 0 <= u-v+out_off < 7, else 0.  One matmul per dy computes the
    full horizontal extent of the 7x7 conv for a tile of packed image rows."""
    u = np.arange(w_in_pad)[:, None]
    v = np.arange(w_out_pad)[None, :]
    dx = u - v + out_off
    xpix = v - out_off
    valid = (dx >= 0) & (dx < 7) & (xpix >= 0) & (xpix < w)
    dxc = np.clip(dx, 0, 6)
    bw = jnp.asarray(wk)[:, dxc, :, :]                                  # (7,wi,wo,ci,co)
    bw = bw * jnp.asarray(valid, jnp.float32)[None, :, :, None, None]
    bw = jnp.transpose(bw, (0, 1, 3, 2, 4))                             # (7,wi,ci,wo,co)
    return bw.reshape(7, w_in_pad * wk.shape[2], w_out_pad * wk.shape[3])


def _packed_row(vec, reps, col_mask=None):
    """(ch,) -> (1, reps*ch) tiled row; optional per-column 0/1 mask of length reps."""
    row = jnp.tile(vec, (reps,))
    if col_mask is not None:
        row = row * jnp.repeat(jnp.asarray(col_mask, jnp.float32), vec.shape[0])
    return row.reshape(1, -1)


def _bn_scale_shift(ssum, ssq, wp, ch, gamma, beta, n):
    # train-mode BatchNorm: batch statistics, biased variance.
    s = jnp.sum(ssum, axis=(0, 1)).reshape(wp, ch).sum(axis=0)
    q = jnp.sum(ssq, axis=(0, 1)).reshape(wp, ch).sum(axis=0)
    mu = s / n
    var = jnp.maximum(q / n - mu * mu, 0.0)
    scale = gamma[0] * jax.lax.rsqrt(var + BN_EPS)
    shift = beta[0] - mu * scale
    return scale, shift


# --------------------------------------------------------------------------
# Parameters (deterministic, shapes per GAM_Attention.__init__)
# --------------------------------------------------------------------------
def init_params(key, c, rate, cout):
    cr = int(c / rate)
    ks = jax.random.split(key, 12)
    p = {}
    p["w1"] = 0.1 * jax.random.normal(ks[0], (c, cr), jnp.float32)        # Linear(c, c/r)
    p["b1"] = 0.1 * jax.random.normal(ks[1], (1, cr), jnp.float32)
    p["w2"] = 0.1 * jax.random.normal(ks[2], (cr, c), jnp.float32)        # Linear(c/r, c)
    p["b2"] = 0.1 * jax.random.normal(ks[3], (1, c), jnp.float32)
    p["wc1"] = 0.1 * jax.random.normal(ks[4], (7, 7, c, cr), jnp.float32)  # Conv2d(c, c/r, 7, p=3), HWIO
    p["bc1"] = 0.1 * jax.random.normal(ks[5], (1, cr), jnp.float32)
    p["g1"] = 1.0 + 0.1 * jax.random.normal(ks[6], (1, cr), jnp.float32)   # BatchNorm2d(c/r)
    p["be1"] = 0.1 * jax.random.normal(ks[7], (1, cr), jnp.float32)
    p["wc2"] = 0.1 * jax.random.normal(ks[8], (7, 7, cr, cout), jnp.float32)  # Conv2d(c/r, cout, 7, p=3)
    p["bc2"] = 0.1 * jax.random.normal(ks[9], (1, cout), jnp.float32)
    p["g2"] = 1.0 + 0.1 * jax.random.normal(ks[10], (1, cout), jnp.float32)   # BatchNorm2d(cout)
    p["be2"] = 0.1 * jax.random.normal(ks[11], (1, cout), jnp.float32)
    return p


# --------------------------------------------------------------------------
# Forward (Pallas) and pure-JAX reference
# --------------------------------------------------------------------------
def gam_attention(x_nchw, p, *, row_tile=ROW_TILE, conv_row_tile=CONV_ROW_TILE):
    b, c, h, w = x_nchw.shape
    cr = p["w1"].shape[1]
    cout = p["wc2"].shape[3]
    assert cout == c, "final x * x_spatial_att requires out_channels == in_channels"
    n = b * h * w

    # packing geometry
    pk = max(1, 128 // c)                      # pixels per packed row (pointwise kernels)
    assert n % pk == 0, "toy demo assumes b*h*w divisible by the lane-packing factor"
    tr = min(conv_row_tile, h)
    assert h % tr == 0 and tr % 8 == 0 and h % 8 == 0
    wp1 = _pad_width_for(c, w)                 # conv1 input padded width
    wp2 = _pad_width_for(cr, w)                # conv1 output / conv2 input padded width
    l1, l2 = wp1 * c, wp2 * cr
    tm = min(row_tile, n // pk)

    # parameter repacking (trace-time, tiny)
    w1bd = _block_diag(p["w1"], pk); b1t = jnp.tile(p["b1"], (1, pk))
    w2bd = _block_diag(p["w2"], pk); b2t = jnp.tile(p["b2"], (1, pk))
    bw1 = _banded_conv_weight(p["wc1"], w, wp1, wp2, out_off=3)
    bw2 = _banded_conv_weight(p["wc2"], w, wp2, w, out_off=0)
    col1 = (np.arange(wp2) >= 3) & (np.arange(wp2) < 3 + w)   # interior output columns
    brow1 = _packed_row(p["bc1"][0], wp2, col1)
    brow2 = _packed_row(p["bc2"][0], w)
    dummy1 = jnp.zeros((1, l1), jnp.float32)                  # unused scale/shift for conv1

    # K1: channel-attention MLP fused with x*att (lane-dense packed rows)
    x_pk = jnp.transpose(x_nchw, (0, 2, 3, 1)).reshape(n // pk, pk * c).astype(jnp.float32)
    y_pk = _channel_attention(x_pk, w1bd, b1t, w2bd, b2t, tm)

    # K2: conv1 7x7 (+bias), per-tile BN partial stats
    y_img = y_pk.reshape(b, h, w, c)
    y_pad = jnp.pad(y_img, ((0, 0), (3, tr - 3), (3, wp1 - 3 - w), (0, 0)))
    y_pad = y_pad.reshape(b * (h + tr), l1)
    z1, s1, q1 = _conv7(y_pad, bw1, brow1, dummy1, dummy1,
                        b=b, h=h, tr=tr, fuse_bn_relu=False)
    sc1, sh1 = _bn_scale_shift(s1, q1, wp2, cr, p["g1"], p["be1"], n)

    # K3: conv2 7x7 (+bias) with BN1+ReLU fused on its input, BN2 partial stats
    z1_pad = jnp.pad(z1.reshape(b, h, l2), ((0, 0), (3, tr - 3), (0, 0)))
    z1_pad = z1_pad.reshape(b * (h + tr), l2)
    sc1_row = _packed_row(sc1, wp2)
    sh1_row = _packed_row(sh1, wp2, col1)
    z2, s2, q2 = _conv7(z1_pad, bw2, brow2, sc1_row, sh1_row,
                        b=b, h=h, tr=tr, fuse_bn_relu=True)
    sc2, sh2 = _bn_scale_shift(s2, q2, w, cout, p["g2"], p["be2"], n)

    # K4: BN2 + sigmoid + final multiply with y (lane-dense, y aliased into out)
    z2_pk = z2.reshape(n // pk, pk * cout)
    out_pk = _bn_sigmoid_mul(z2_pk, _packed_row(sc2, pk), _packed_row(sh2, pk), y_pk, tm)

    return jnp.transpose(out_pk.reshape(b, h, w, c), (0, 3, 1, 2))


def gam_attention_ref(x_nchw, p):
    x_nhwc = jnp.transpose(x_nchw, (0, 2, 3, 1)).astype(jnp.float32)
    att = jnp.maximum(x_nhwc @ p["w1"] + p["b1"][0], 0.0) @ p["w2"] + p["b2"][0]
    y = x_nhwc * att

    def conv_bn(x, wk, bias, gamma, beta):
        z = jax.lax.conv_general_dilated(
            x, wk, window_strides=(1, 1), padding="SAME",
            dimension_numbers=("NHWC", "HWIO", "NHWC")) + bias[0]
        mu = jnp.mean(z, axis=(0, 1, 2), keepdims=True)
        var = jnp.mean((z - mu) ** 2, axis=(0, 1, 2), keepdims=True)
        return (z - mu) * gamma[0] * jax.lax.rsqrt(var + BN_EPS) + beta[0]

    a1 = jnp.maximum(conv_bn(y, p["wc1"], p["bc1"], p["g1"], p["be1"]), 0.0)
    s = jax.nn.sigmoid(conv_bn(a1, p["wc2"], p["bc2"], p["g2"], p["be2"]))
    return jnp.transpose(y * s, (0, 3, 1, 2))


# --------------------------------------------------------------------------
if __name__ == "__main__":
    key = jax.random.PRNGKey(0)
    kx, kp = jax.random.split(key)

    B, C, H, W = 2, 8, 16, 16
    RATE = 4
    # out_channels == in_channels (required by the final `x * x_spatial_att`)
    x = jax.random.normal(kx, (B, C, H, W), jnp.float32)
    params = init_params(kp, C, RATE, C)

    # small conv row tile so the toy problem exercises a multi-step (b, tiles) grid
    fwd = jax.jit(lambda xx, pp: gam_attention(xx, pp, conv_row_tile=8))
    out = jax.block_until_ready(fwd(x, params))

    ref = gam_attention_ref(x, params)
    assert out.shape == (B, C, H, W)
    np.testing.assert_allclose(np.asarray(out), np.asarray(ref), rtol=2e-3, atol=2e-4)

    print("KERNEL_OK")
</pallas_src>

<mosaic_0001>
module attributes {stable_mosaic.version = 11 : i64} {
  func.func @_channel_mlp_kernel(%arg0: i32, %arg1: memref<32x128xf32, #tpu.memory_space<vmem>>, %arg2: memref<128x32xf32, #tpu.memory_space<vmem>>, %arg3: memref<1x32xf32, #tpu.memory_space<vmem>>, %arg4: memref<32x128xf32, #tpu.memory_space<vmem>>, %arg5: memref<1x128xf32, #tpu.memory_space<vmem>>, %arg6: memref<32x128xf32, #tpu.memory_space<vmem>>) attributes {dimension_semantics = [#tpu.dimension_semantics<parallel>], iteration_bounds = array<i64: 1>, scalar_prefetch = 0 : i64, scratch_operands = 0 : i64, tpu.core_type = #tpu.core_type<tc>, window_params = [{transform_indices = @transform_0, window_bounds = array<i64: 32, 128>}, {pipeline_mode = #tpu.pipeline_mode<synchronous>, transform_indices = @transform_1, window_bounds = array<i64: 128, 32>}, {pipeline_mode = #tpu.pipeline_mode<synchronous>, transform_indices = @transform_2, window_bounds = array<i64: 1, 32>}, {pipeline_mode = #tpu.pipeline_mode<synchronous>, transform_indices = @transform_3, window_bounds = array<i64: 32, 128>}, {pipeline_mode = #tpu.pipeline_mode<synchronous>, transform_indices = @transform_4, window_bounds = array<i64: 1, 128>}, {transform_indices = @transform_5, window_bounds = array<i64: 32, 128>}]} {
    %c0 = arith.constant 0 : index
    %c0_0 = arith.constant 0 : index
    %0 = vector.load %arg1[%c0, %c0_0] : memref<32x128xf32, #tpu.memory_space<vmem>>, vector<32x128xf32>
    %c0_1 = arith.constant 0 : index
    %c0_2 = arith.constant 0 : index
    %1 = vector.load %arg2[%c0_1, %c0_2] : memref<128x32xf32, #tpu.memory_space<vmem>>, vector<128x32xf32>
    %cst = arith.constant dense<0.000000e+00> : vector<32x32xf32>
    %2 = tpu.matmul %0, %1, %cst {dimension_numbers = #tpu.dot_dimension_numbers<[1], [0], [0], [1], [0, 0, 1, 1], [], []>} : vector<32x128xf32>, vector<128x32xf32>, vector<32x32xf32> -> vector<32x32xf32>
    %c0_3 = arith.constant 0 : index
    %c0_4 = arith.constant 0 : index
    %3 = vector.load %arg3[%c0_3, %c0_4] : memref<1x32xf32, #tpu.memory_space<vmem>>, vector<1x32xf32>
    %4 = vector.broadcast %3 : vector<1x32xf32> to vector<32x32xf32>
    %5 = arith.addf %2, %4 : vector<32x32xf32>
    %cst_5 = arith.constant 0.000000e+00 : f32
    %6 = vector.broadcast %cst_5 : f32 to vector<32x32xf32>
    %7 = arith.maximumf %5, %6 : vector<32x32xf32>
    %c0_6 = arith.constant 0 : index
    %c0_7 = arith.constant 0 : index
    %8 = vector.load %arg4[%c0_6, %c0_7] : memref<32x128xf32, #tpu.memory_space<vmem>>, vector<32x128xf32>
    %cst_8 = arith.constant dense<0.000000e+00> : vector<32x128xf32>
    %9 = tpu.matmul %7, %8, %cst_8 {dimension_numbers = #tpu.dot_dimension_numbers<[1], [0], [0], [1], [0, 0, 1, 1], [], []>} : vector<32x32xf32>, vector<32x128xf32>, vector<32x128xf32> -> vector<32x128xf32>
    %c0_9 = arith.constant 0 : index
    %c0_10 = arith.constant 0 : index
    %10 = vector.load %arg5[%c0_9, %c0_10] : memref<1x128xf32, #tpu.memory_space<vmem>>, vector<1x128xf32>
    %11 = vector.broadcast %10 : vector<1x128xf32> to vector<32x128xf32>
    %12 = arith.addf %9, %11 : vector<32x128xf32>
    %13 = arith.mulf %0, %12 : vector<32x128xf32>
    %c0_11 = arith.constant 0 : index
    %c0_12 = arith.constant 0 : index
    %14 = vector.load %arg6[%c0_11, %c0_12] : memref<32x128xf32, #tpu.memory_space<vmem>>, vector<32x128xf32>
    tpu.vector_store %arg6[%c0_11, %c0_12], %13 {strides = array<i32>} : memref<32x128xf32, #tpu.memory_space<vmem>>, vector<32x128xf32>,
    return
  }
  func.func @transform_0(%arg0: i32) -> (i32, i32) {
    %c0_i32 = arith.constant 0 : i32
    %c0_i32_0 = arith.constant 0 : i32
    return %arg0, %c0_i32 : i32, i32
  }
  func.func @transform_1(%arg0: i32) -> (i32, i32) {
    %c0_i32 = arith.constant 0 : i32
    %c0_i32_0 = arith.constant 0 : i32
    %c0_i32_1 = arith.constant 0 : i32
    return %c0_i32, %c0_i32_0 : i32, i32
  }
  func.func @transform_2(%arg0: i32) -> (i32, i32) {
    %c0_i32 = arith.constant 0 : i32
    %c0_i32_0 = arith.constant 0 : i32
    %c0_i32_1 = arith.constant 0 : i32
    return %c0_i32, %c0_i32_0 : i32, i32
  }
  func.func @transform_3(%arg0: i32) -> (i32, i32) {
    %c0_i32 = arith.constant 0 : i32
    %c0_i32_0 = arith.constant 0 : i32
    %c0_i32_1 = arith.constant 0 : i32
    return %c0_i32, %c0_i32_0 : i32, i32
  }
  func.func @transform_4(%arg0: i32) -> (i32, i32) {
    %c0_i32 = arith.constant 0 : i32
    %c0_i32_0 = arith.constant 0 : i32
    %c0_i32_1 = arith.constant 0 : i32
    return %c0_i32, %c0_i32_0 : i32, i32
  }
  func.func @transform_5(%arg0: i32) -> (i32, i32) {
    %c0_i32 = arith.constant 0 : i32
    %c0_i32_0 = arith.constant 0 : i32
    return %arg0, %c0_i32 : i32, i32
  }
}

module attributes {stable_mosaic.version = 11 : i64} {
  func.func @_conv7_kernel(%arg0: i32, %arg1: i32, %arg2: memref<8x256xf32, #tpu.memory_space<vmem>>, %arg3: memref<8x256xf32, #tpu.memory_space<vmem>>, %arg4: memref<7x256x128xf32, #tpu.memory_space<vmem>>, %arg5: memref<1x128xf32, #tpu.memory_space<vmem>>, %arg6: memref<1x256xf32, #tpu.memory_space<vmem>>, %arg7: memref<1x256xf32, #tpu.memory_space<vmem>>, %arg8: memref<8x128xf32, #tpu.memory_space<vmem>>, %arg9: memref<1x1x128xf32, #tpu.memory_space<vmem>>, %arg10: memref<1x1x128xf32, #tpu.memory_space<vmem>>) attributes {dimension_semantics = [#tpu.dimension_semantics<parallel>, #tpu.dimension_semantics<parallel>], iteration_bounds = array<i64: 2, 2>, scalar_prefetch = 0 : i64, scratch_operands = 0 : i64, tpu.core_type = #tpu.core_type<tc>, window_params = [{transform_indices = @transform_0, window_bounds = array<i64: 8, 256>}, {transform_indices = @transform_1, window_bounds = array<i64: 8, 256>}, {pipeline_mode = #tpu.pipeline_mode<synchronous>, transform_indices = @transform_2, window_bounds = array<i64: 7, 256, 128>}, {pipeline_mode = #tpu.pipeline_mode<synchronous>, transform_indices = @transform_3, window_bounds = array<i64: 1, 128>}, {pipeline_mode = #tpu.pipeline_mode<synchronous>, transform_indices = @transform_4, window_bounds = array<i64: 1, 256>}, {pipeline_mode = #tpu.pipeline_mode<synchronous>, transform_indices = @transform_5, window_bounds = array<i64: 1, 256>}, {transform_indices = @transform_6, window_bounds = array<i64: 8, 128>}, {transform_indices = @transform_7, window_bounds = array<i64: 1, 1, 128>}, {transform_indices = @transform_8, window_bounds = array<i64: 1, 1, 128>}]} {
    %c0 = arith.constant 0 : index
    %c0_0 = arith.constant 0 : index
    %0 = vector.load %arg2[%c0, %c0_0] : memref<8x256xf32, #tpu.memory_space<vmem>>, vector<8x256xf32>
    %c0_1 = arith.constant 0 : index
    %c0_2 = arith.constant 0 : index
    %1 = vector.load %arg3[%c0_1, %c0_2] : memref<8x256xf32, #tpu.memory_space<vmem>>, vector<6x256xf32>
    %2 = tpu.concatenate %0, %1 in 0 : vector<8x256xf32>, vector<6x256xf32> -> vector<14x256xf32>
    %cst = arith.constant 0.000000e+00 : f32
    %3 = vector.broadcast %cst : f32 to vector<8x128xf32>
    %c0_3 = arith.constant 0 : index
    %c0_4 = arith.constant 0 : index
    %4 = vector.load %arg5[%c0_3, %c0_4] : memref<1x128xf32, #tpu.memory_space<vmem>>, vector<1x128xf32>
    %5 = vector.broadcast %4 : vector<1x128xf32> to vector<8x128xf32>
    %6 = arith.addf %3, %5 : vector<8x128xf32>
    %7 = vector.extract_strided_slice %2 {offsets = [0, 0], sizes = [8, 256], strides = [1, 1]} : vector<14x256xf32> to vector<8x256xf32>
    %c0_5 = arith.constant 0 : index
    %c0_6 = arith.constant 0 : index
    %c0_7 = arith.constant 0 : index
    %8 = vector.load %arg4[%c0_5, %c0_6, %c0_7] : memref<7x256x128xf32, #tpu.memory_space<vmem>>, vector<1x256x128xf32>
    %9 = vector.shape_cast %8 : vector<1x256x128xf32> to vector<256x128xf32>
    %cst_8 = arith.constant dense<0.000000e+00> : vector<8x128xf32>
    %10 = tpu.matmul %7, %9, %cst_8 {dimension_numbers = #tpu.dot_dimension_numbers<[1], [0], [0], [1], [0, 0, 1, 1], [], []>} : vector<8x256xf32>, vector<256x128xf32>, vector<8x128xf32> -> vector<8x128xf32>
    %11 = arith.addf %6, %10 : vector<8x128xf32>
    %12 = vector.extract_strided_slice %2 {offsets = [1, 0], sizes = [8, 256], strides = [1, 1]} : vector<14x256xf32> to vector<8x256xf32>
    %c1 = arith.constant 1 : index
    %c0_9 = arith.constant 0 : index
    %c0_10 = arith.constant 0 : index
    %13 = vector.load %arg4[%c1, %c0_9, %c0_10] : memref<7x256x128xf32, #tpu.memory_space<vmem>>, vector<1x256x128xf32>
    %14 = vector.shape_cast %13 : vector<1x256x128xf32> to vector<256x128xf32>
    %cst_11 = arith.constant dense<0.000000e+00> : vector<8x128xf32>
    %15 = tpu.matmul %12, %14, %cst_11 {dimension_numbers = #tpu.dot_dimension_numbers<[1], [0], [0], [1], [0, 0, 1, 1], [], []>} : vector<8x256xf32>, vector<256x128xf32>, vector<8x128xf32> -> vector<8x128xf32>
    %16 = arith.addf %11, %15 : vector<8x128xf32>
    %17 = vector.extract_strided_slice %2 {offsets = [2, 0], sizes = [8, 256], strides = [1, 1]} : vector<14x256xf32> to vector<8x256xf32>
    %c2 = arith.constant 2 : index
    %c0_12 = arith.constant 0 : index
    %c0_13 = arith.constant 0 : index
    %18 = vector.load %arg4[%c2, %c0_12, %c0_13] : memref<7x256x128xf32, #tpu.memory_space<vmem>>, vector<1x256x128xf32>
    %19 = vector.shape_cast %18 : vector<1x256x128xf32> to vector<256x128xf32>
    %cst_14 = arith.constant dense<0.000000e+00> : vector<8x128xf32>
    %20 = tpu.matmul %17, %19, %cst_14 {dimension_numbers = #tpu.dot_dimension_numbers<[1], [0], [0], [1], [0, 0, 1, 1], [], []>} : vector<8x256xf32>, vector<256x128xf32>, vector<8x128xf32> -> vector<8x128xf32>
    %21 = arith.addf %16, %20 : vector<8x128xf32>
    %22 = vector.extract_strided_slice %2 {offsets = [3, 0], sizes = [8, 256], strides = [1, 1]} : vector<14x256xf32> to vector<8x256xf32>
    %c3 = arith.constant 3 : index
    %c0_15 = arith.constant 0 : index
    %c0_16 = arith.constant 0 : index
    %23 = vector.load %arg4[%c3, %c0_15, %c0_16] : memref<7x256x128xf32, #tpu.memory_space<vmem>>, vector<1x256x128xf32>
    %24 = vector.shape_cast %23 : vector<1x256x128xf32> to vector<256x128xf32>
    %cst_17 = arith.constant dense<0.000000e+00> : vector<8x128xf32>
    %25 = tpu.matmul %22, %24, %cst_17 {dimension_numbers = #tpu.dot_dimension_numbers<[1], [0], [0], [1], [0, 0, 1, 1], [], []>} : vector<8x256xf32>, vector<256x128xf32>, vector<8x128xf32> -> vector<8x128xf32>
    %26 = arith.addf %21, %25 : vector<8x128xf32>
    %27 = vector.extract_strided_slice %2 {offsets = [4, 0], sizes = [8, 256], strides = [1, 1]} : vector<14x256xf32> to vector<8x256xf32>
    %c4 = arith.constant 4 : index
    %c0_18 = arith.constant 0 : index
    %c0_19 = arith.constant 0 : index
    %28 = vector.load %arg4[%c4, %c0_18, %c0_19] : memref<7x256x128xf32, #tpu.memory_space<vmem>>, vector<1x256x128xf32>
    %29 = vector.shape_cast %28 : vector<1x256x128xf32> to vector<256x128xf32>
    %cst_20 = arith.constant dense<0.000000e+00> : vector<8x128xf32>
    %30 = tpu.matmul %27, %29, %cst_20 {dimension_numbers = #tpu.dot_dimension_numbers<[1], [0], [0], [1], [0, 0, 1, 1], [], []>} : vector<8x256xf32>, vector<256x128xf32>, vector<8x128xf32> -> vector<8x128xf32>
    %31 = arith.addf %26, %30 : vector<8x128xf32>
    %32 = vector.extract_strided_slice %2 {offsets = [5, 0], sizes = [8, 256], strides = [1, 1]} : vector<14x256xf32> to vector<8x256xf32>
    %c5 = arith.constant 5 : index
    %c0_21 = arith.constant 0 : index
    %c0_22 = arith.constant 0 : index
    %33 = vector.load %arg4[%c5, %c0_21, %c0_22] : memref<7x256x128xf32, #tpu.memory_space<vmem>>, vector<1x256x128xf32>
    %34 = vector.shape_cast %33 : vector<1x256x128xf32> to vector<256x128xf32>
    %cst_23 = arith.constant dense<0.000000e+00> : vector<8x128xf32>
    %35 = tpu.matmul %32, %34, %cst_23 {dimension_numbers = #tpu.dot_dimension_numbers<[1], [0], [0], [1], [0, 0, 1, 1], [], []>} : vector<8x256xf32>, vector<256x128xf32>, vector<8x128xf32> -> vector<8x128xf32>
    %36 = arith.addf %31, %35 : vector<8x128xf32>
    %37 = vector.extract_strided_slice %2 {offsets = [6, 0], sizes = [8, 256], strides = [1, 1]} : vector<14x256xf32> to vector<8x256xf32>
    %c6 = arith.constant 6 : index
    %c0_24 = arith.constant 0 : index
    %c0_25 = arith.constant 0 : index
    %38 = vector.load %arg4[%c6, %c0_24, %c0_25] : memref<7x256x128xf32, #tpu.memory_space<vmem>>, vector<1x256x128xf32>
    %39 = vector.shape_cast %38 : vector<1x256x128xf32> to vector<256x128xf32>
    %cst_26 = arith.constant dense<0.000000e+00> : vector<8x128xf32>
    %40 = tpu.matmul %37, %39, %cst_26 {dimension_numbers = #tpu.dot_dimension_numbers<[1], [0], [0], [1], [0, 0, 1, 1], [], []>} : vector<8x256xf32>, vector<256x128xf32>, vector<8x128xf32> -> vector<8x128xf32>
    %41 = arith.addf %36, %40 : vector<8x128xf32>
    %c0_27 = arith.constant 0 : index
    %c0_28 = arith.constant 0 : index
    %42 = vector.load %arg8[%c0_27, %c0_28] : memref<8x128xf32, #tpu.memory_space<vmem>>, vector<8x128xf32>
    tpu.vector_store %arg8[%c0_27, %c0_28], %41 {strides = array<i32>} : memref<8x128xf32, #tpu.memory_space<vmem>>, vector<8x128xf32>,
    %cst_29 = arith.constant dense<0.000000e+00> : vector<128xf32>
    %43 = vector.multi_reduction <add>, %41, %cst_29 [0] : vector<8x128xf32> to vector<128xf32>
    %44 = vector.shape_cast %43 : vector<128xf32> to vector<1x128xf32>
    %c0_30 = arith.constant 0 : index
    %c0_31 = arith.constant 0 : index
    %c0_32 = arith.constant 0 : index
    %45 = vector.load %arg9[%c0_30, %c0_31, %c0_32] : memref<1x1x128xf32, #tpu.memory_space<vmem>>, vector<1x1x128xf32>
    %46 = vector.shape_cast %45 : vector<1x1x128xf32> to vector<1x128xf32>
    %47 = vector.shape_cast %44 : vector<1x128xf32> to vector<1x1x128xf32>
    tpu.vector_store %arg9[%c0_30, %c0_31, %c0_32], %47 {strides = array<i32>} : memref<1x1x128xf32, #tpu.memory_space<vmem>>, vector<1x1x128xf32>,
    %48 = arith.mulf %41, %41 : vector<8x128xf32>
    %cst_33 = arith.constant dense<0.000000e+00> : vector<128xf32>
    %49 = vector.multi_reduction <add>, %48, %cst_33 [0] : vector<8x128xf32> to vector<128xf32>
    %50 = vector.shape_cast %49 : vector<128xf32> to vector<1x128xf32>
    %c0_34 = arith.constant 0 : index
    %c0_35 = arith.constant 0 : index
    %c0_36 = arith.constant 0 : index
    %51 = vector.load %arg10[%c0_34, %c0_35, %c0_36] : memref<1x1x128xf32, #tpu.memory_space<vmem>>, vector<1x1x128xf32>
    %52 = vector.shape_cast %51 : vector<1x1x128xf32> to vector<1x128xf32>
    %53 = vector.shape_cast %50 : vector<1x128xf32> to vector<1x1x128xf32>
    tpu.vector_store %arg10[%c0_34, %c0_35, %c0_36], %53 {strides = array<i32>} : memref<1x1x128xf32, #tpu.memory_space<vmem>>, vector<1x1x128xf32>,
    return
  }
  func.func @transform_0(%arg0: i32, %arg1: i32) -> (i32, i32) {
    %c3_i32 = arith.constant 3 : i32
    %0 = arith.muli %arg0, %c3_i32 : i32
    %1 = arith.addi %0, %arg1 : i32
    %c0_i32 = arith.constant 0 : i32
    %c0_i32_0 = arith.constant 0 : i32
    return %1, %c0_i32 : i32, i32
  }
  func.func @transform_1(%arg0: i32, %arg1: i32) -> (i32, i32) {
    %c3_i32 = arith.constant 3 : i32
    %0 = arith.muli %arg0, %c3_i32 : i32
    %c1_i32 = arith.constant 1 : i32
    %1 = arith.addi %arg1, %c1_i32 : i32
    %c1_i32_0 = arith.constant 1 : i32
    %2 = arith.muli %1, %c1_i32_0 : i32
    %3 = arith.addi %0, %2 : i32
    %c0_i32 = arith.constant 0 : i32
    %c0_i32_1 = arith.constant 0 : i32
    return %3, %c0_i32 : i32, i32
  }
  func.func @transform_2(%arg0: i32, %arg1: i32) -> (i32, i32, i32) {
    %c0_i32 = arith.constant 0 : i32
    %c0_i32_0 = arith.constant 0 : i32
    %c0_i32_1 = arith.constant 0 : i32
    %c0_i32_2 = arith.constant 0 : i32
    return %c0_i32, %c0_i32_0, %c0_i32_1 : i32, i32, i32
  }
  func.func @transform_3(%arg0: i32, %arg1: i32) -> (i32, i32) {
    %c0_i32 = arith.constant 0 : i32
    %c0_i32_0 = arith.constant 0 : i32
    %c0_i32_1 = arith.constant 0 : i32
    return %c0_i32, %c0_i32_0 : i32, i32
  }
  func.func @transform_4(%arg0: i32, %arg1: i32) -> (i32, i32) {
    %c0_i32 = arith.constant 0 : i32
    %c0_i32_0 = arith.constant 0 : i32
    %c0_i32_1 = arith.constant 0 : i32
    return %c0_i32, %c0_i32_0 : i32, i32
  }
  func.func @transform_5(%arg0: i32, %arg1: i32) -> (i32, i32) {
    %c0_i32 = arith.constant 0 : i32
    %c0_i32_0 = arith.constant 0 : i32
    %c0_i32_1 = arith.constant 0 : i32
    return %c0_i32, %c0_i32_0 : i32, i32
  }
  func.func @transform_6(%arg0: i32, %arg1: i32) -> (i32, i32) {
    %c2_i32 = arith.constant 2 : i32
    %0 = arith.muli %arg0, %c2_i32 : i32
    %1 = arith.addi %0, %arg1 : i32
    %c0_i32 = arith.constant 0 : i32
    %c0_i32_0 = arith.constant 0 : i32
    return %1, %c0_i32 : i32, i32
  }
  func.func @transform_7(%arg0: i32, %arg1: i32) -> (i32, i32, i32) {
    %c2_i32 = arith.constant 2 : i32
    %0 = arith.muli %arg0, %c2_i32 : i32
    %1 = arith.addi %0, %arg1 : i32
    %c0_i32 = arith.constant 0 : i32
    %c0_i32_0 = arith.constant 0 : i32
    %c0_i32_1 = arith.constant 0 : i32
    return %1, %c0_i32, %c0_i32_0 : i32, i32, i32
  }
  func.func @transform_8(%arg0: i32, %arg1: i32) -> (i32, i32, i32) {
    %c2_i32 = arith.constant 2 : i32
    %0 = arith.muli %arg0, %c2_i32 : i32
    %1 = arith.addi %0, %arg1 : i32
    %c0_i32 = arith.constant 0 : i32
    %c0_i32_0 = arith.constant 0 : i32
    %c0_i32_1 = arith.constant 0 : i32
    return %1, %c0_i32, %c0_i32_0 : i32, i32, i32
  }
}

module attributes {stable_mosaic.version = 11 : i64} {
  func.func @_conv7_kernel(%arg0: i32, %arg1: i32, %arg2: memref<8x128xf32, #tpu.memory_space<vmem>>, %arg3: memref<8x128xf32, #tpu.memory_space<vmem>>, %arg4: memref<7x128x128xf32, #tpu.memory_space<vmem>>, %arg5: memref<1x128xf32, #tpu.memory_space<vmem>>, %arg6: memref<1x128xf32, #tpu.memory_space<vmem>>, %arg7: memref<1x128xf32, #tpu.memory_space<vmem>>, %arg8: memref<8x128xf32, #tpu.memory_space<vmem>>, %arg9: memref<1x1x128xf32, #tpu.memory_space<vmem>>, %arg10: memref<1x1x128xf32, #tpu.memory_space<vmem>>) attributes {dimension_semantics = [#tpu.dimension_semantics<parallel>, #tpu.dimension_semantics<parallel>], iteration_bounds = array<i64: 2, 2>, scalar_prefetch = 0 : i64, scratch_operands = 0 : i64, tpu.core_type = #tpu.core_type<tc>, window_params = [{transform_indices = @transform_0, window_bounds = array<i64: 8, 128>}, {transform_indices = @transform_1, window_bounds = array<i64: 8, 128>}, {pipeline_mode = #tpu.pipeline_mode<synchronous>, transform_indices = @transform_2, window_bounds = array<i64: 7, 128, 128>}, {pipeline_mode = #tpu.pipeline_mode<synchronous>, transform_indices = @transform_3, window_bounds = array<i64: 1, 128>}, {pipeline_mode = #tpu.pipeline_mode<synchronous>, transform_indices = @transform_4, window_bounds = array<i64: 1, 128>}, {pipeline_mode = #tpu.pipeline_mode<synchronous>, transform_indices = @transform_5, window_bounds = array<i64: 1, 128>}, {transform_indices = @transform_6, window_bounds = array<i64: 8, 128>}, {transform_indices = @transform_7, window_bounds = array<i64: 1, 1, 128>}, {transform_indices = @transform_8, window_bounds = array<i64: 1, 1, 128>}]} {
    %c0 = arith.constant 0 : index
    %c0_0 = arith.constant 0 : index
    %0 = vector.load %arg2[%c0, %c0_0] : memref<8x128xf32, #tpu.memory_space<vmem>>, vector<8x128xf32>
    %c0_1 = arith.constant 0 : index
    %c0_2 = arith.constant 0 : index
    %1 = vector.load %arg3[%c0_1, %c0_2] : memref<8x128xf32, #tpu.memory_space<vmem>>, vector<6x128xf32>
    %2 = tpu.concatenate %0, %1 in 0 : vector<8x128xf32>, vector<6x128xf32> -> vector<14x128xf32>
    %c8_i32 = arith.constant 8 : i32
    %3 = arith.muli %arg1, %c8_i32 : i32
    %4 = tpu.iota {dimensions = array<i32: 0>} : vector<14x1xi32>
    %5 = vector.broadcast %3 : i32 to vector<14x1xi32>
    %6 = arith.addi %5, %4 : vector<14x1xi32>
    %c3_i32 = arith.constant 3 : i32
    %7 = vector.broadcast %c3_i32 : i32 to vector<14x1xi32>
    %8 = arith.cmpi sge, %6, %7 : vector<14x1xi32>
    %c19_i32 = arith.constant 19 : i32
    %9 = vector.broadcast %c19_i32 : i32 to vector<14x1xi32>
    %10 = arith.cmpi slt, %6, %9 : vector<14x1xi32>
    %11 = arith.andi %8, %10 : vector<14x1xi1>
    %c0_3 = arith.constant 0 : index
    %c0_4 = arith.constant 0 : index
    %12 = vector.load %arg6[%c0_3, %c0_4] : memref<1x128xf32, #tpu.memory_space<vmem>>, vector<1x128xf32>
    %13 = vector.broadcast %12 : vector<1x128xf32> to vector<14x128xf32>
    %14 = arith.mulf %2, %13 : vector<14x128xf32>
    %c0_5 = arith.constant 0 : index
    %c0_6 = arith.constant 0 : index
    %15 = vector.load %arg7[%c0_5, %c0_6] : memref<1x128xf32, #tpu.memory_space<vmem>>, vector<1x128xf32>
    %16 = vector.broadcast %15 : vector<1x128xf32> to vector<14x128xf32>
    %17 = arith.addf %14, %16 : vector<14x128xf32>
    %cst = arith.constant 0.000000e+00 : f32
    %18 = vector.broadcast %cst : f32 to vector<14x128xf32>
    %19 = arith.maximumf %17, %18 : vector<14x128xf32>
    %cst_7 = arith.constant 0.000000e+00 : f32
    %20 = vector.shape_cast %11 : vector<14x1xi1> to vector<14x1xi1>
    %21 = vector.broadcast %20 : vector<14x1xi1> to vector<14x128xi1>
    %22 = vector.broadcast %cst_7 : f32 to vector<14x128xf32>
    %23 = arith.select %21, %19, %22 : vector<14x128xi1>, vector<14x128xf32>
    %cst_8 = arith.constant 0.000000e+00 : f32
    %24 = vector.broadcast %cst_8 : f32 to vector<8x128xf32>
    %c0_9 = arith.constant 0 : index
    %c0_10 = arith.constant 0 : index
    %25 = vector.load %arg5[%c0_9, %c0_10] : memref<1x128xf32, #tpu.memory_space<vmem>>, vector<1x128xf32>
    %26 = vector.broadcast %25 : vector<1x128xf32> to vector<8x128xf32>
    %27 = arith.addf %24, %26 : vector<8x128xf32>
    %28 = vector.extract_strided_slice %23 {offsets = [0, 0], sizes = [8, 128], strides = [1, 1]} : vector<14x128xf32> to vector<8x128xf32>
    %c0_11 = arith.constant 0 : index
    %c0_12 = arith.constant 0 : index
    %c0_13 = arith.constant 0 : index
    %29 = vector.load %arg4[%c0_11, %c0_12, %c0_13] : memref<7x128x128xf32, #tpu.memory_space<vmem>>, vector<1x128x128xf32>
    %30 = vector.shape_cast %29 : vector<1x128x128xf32> to vector<128x128xf32>
    %cst_14 = arith.constant dense<0.000000e+00> : vector<8x128xf32>
    %31 = tpu.matmul %28, %30, %cst_14 {dimension_numbers = #tpu.dot_dimension_numbers<[1], [0], [0], [1], [0, 0, 1, 1], [], []>} : vector<8x128xf32>, vector<128x128xf32>, vector<8x128xf32> -> vector<8x128xf32>
    %32 = arith.addf %27, %31 : vector<8x128xf32>
    %33 = vector.extract_strided_slice %23 {offsets = [1, 0], sizes = [8, 128], strides = [1, 1]} : vector<14x128xf32> to vector<8x128xf32>
    %c1 = arith.constant 1 : index
    %c0_15 = arith.constant 0 : index
    %c0_16 = arith.constant 0 : index
    %34 = vector.load %arg4[%c1, %c0_15, %c0_16] : memref<7x128x128xf32, #tpu.memory_space<vmem>>, vector<1x128x128xf32>
    %35 = vector.shape_cast %34 : vector<1x128x128xf32> to vector<128x128xf32>
    %cst_17 = arith.constant dense<0.000000e+00> : vector<8x128xf32>
    %36 = tpu.matmul %33, %35, %cst_17 {dimension_numbers = #tpu.dot_dimension_numbers<[1], [0], [0], [1], [0, 0, 1, 1], [], []>} : vector<8x128xf32>, vector<128x128xf32>, vector<8x128xf32> -> vector<8x128xf32>
    %37 = arith.addf %32, %36 : vector<8x128xf32>
    %38 = vector.extract_strided_slice %23 {offsets = [2, 0], sizes = [8, 128], strides = [1, 1]} : vector<14x128xf32> to vector<8x128xf32>
    %c2 = arith.constant 2 : index
    %c0_18 = arith.constant 0 : index
    %c0_19 = arith.constant 0 : index
    %39 = vector.load %arg4[%c2, %c0_18, %c0_19] : memref<7x128x128xf32, #tpu.memory_space<vmem>>, vector<1x128x128xf32>
    %40 = vector.shape_cast %39 : vector<1x128x128xf32> to vector<128x128xf32>
    %cst_20 = arith.constant dense<0.000000e+00> : vector<8x128xf32>
    %41 = tpu.matmul %38, %40, %cst_20 {dimension_numbers = #tpu.dot_dimension_numbers<[1], [0], [0], [1], [0, 0, 1, 1], [], []>} : vector<8x128xf32>, vector<128x128xf32>, vector<8x128xf32> -> vector<8x128xf32>
    %42 = arith.addf %37, %41 : vector<8x128xf32>
    %43 = vector.extract_strided_slice %23 {offsets = [3, 0], sizes = [8, 128], strides = [1, 1]} : vector<14x128xf32> to vector<8x128xf32>
    %c3 = arith.constant 3 : index
    %c0_21 = arith.constant 0 : index
    %c0_22 = arith.constant 0 : index
    %44 = vector.load %arg4[%c3, %c0_21, %c0_22] : memref<7x128x128xf32, #tpu.memory_space<vmem>>, vector<1x128x128xf32>
    %45 = vector.shape_cast %44 : vector<1x128x128xf32> to vector<128x128xf32>
    %cst_23 = arith.constant dense<0.000000e+00> : vector<8x128xf32>
    %46 = tpu.matmul %43, %45, %cst_23 {dimension_numbers = #tpu.dot_dimension_numbers<[1], [0], [0], [1], [0, 0, 1, 1], [], []>} : vector<8x128xf32>, vector<128x128xf32>, vector<8x128xf32> -> vector<8x128xf32>
    %47 = arith.addf %42, %46 : vector<8x128xf32>
    %48 = vector.extract_strided_slice %23 {offsets = [4, 0], sizes = [8, 128], strides = [1, 1]} : vector<14x128xf32> to vector<8x128xf32>
    %c4 = arith.constant 4 : index
    %c0_24 = arith.constant 0 : index
    %c0_25 = arith.constant 0 : index
    %49 = vector.load %arg4[%c4, %c0_24, %c0_25] : memref<7x128x128xf32, #tpu.memory_space<vmem>>, vector<1x128x128xf32>
    %50 = vector.shape_cast %49 : vector<1x128x128xf32> to vector<128x128xf32>
    %cst_26 = arith.constant dense<0.000000e+00> : vector<8x128xf32>
    %51 = tpu.matmul %48, %50, %cst_26 {dimension_numbers = #tpu.dot_dimension_numbers<[1], [0], [0], [1], [0, 0, 1, 1], [], []>} : vector<8x128xf32>, vector<128x128xf32>, vector<8x128xf32> -> vector<8x128xf32>
    %52 = arith.addf %47, %51 : vector<8x128xf32>
    %53 = vector.extract_strided_slice %23 {offsets = [5, 0], sizes = [8, 128], strides = [1, 1]} : vector<14x128xf32> to vector<8x128xf32>
    %c5 = arith.constant 5 : index
    %c0_27 = arith.constant 0 : index
    %c0_28 = arith.constant 0 : index
    %54 = vector.load %arg4[%c5, %c0_27, %c0_28] : memref<7x128x128xf32, #tpu.memory_space<vmem>>, vector<1x128x128xf32>
    %55 = vector.shape_cast %54 : vector<1x128x128xf32> to vector<128x128xf32>
    %cst_29 = arith.constant dense<0.000000e+00> : vector<8x128xf32>
    %56 = tpu.matmul %53, %55, %cst_29 {dimension_numbers = #tpu.dot_dimension_numbers<[1], [0], [0], [1], [0, 0, 1, 1], [], []>} : vector<8x128xf32>, vector<128x128xf32>, vector<8x128xf32> -> vector<8x128xf32>
    %57 = arith.addf %52, %56 : vector<8x128xf32>
    %58 = vector.extract_strided_slice %23 {offsets = [6, 0], sizes = [8, 128], strides = [1, 1]} : vector<14x128xf32> to vector<8x128xf32>
    %c6 = arith.constant 6 : index
    %c0_30 = arith.constant 0 : index
    %c0_31 = arith.constant 0 : index
    %59 = vector.load %arg4[%c6, %c0_30, %c0_31] : memref<7x128x128xf32, #tpu.memory_space<vmem>>, vector<1x128x128xf32>
    %60 = vector.shape_cast %59 : vector<1x128x128xf32> to vector<128x128xf32>
    %cst_32 = arith.constant dense<0.000000e+00> : vector<8x128xf32>
    %61 = tpu.matmul %58, %60, %cst_32 {dimension_numbers = #tpu.dot_dimension_numbers<[1], [0], [0], [1], [0, 0, 1, 1], [], []>} : vector<8x128xf32>, vector<128x128xf32>, vector<8x128xf32> -> vector<8x128xf32>
    %62 = arith.addf %57, %61 : vector<8x128xf32>
    %c0_33 = arith.constant 0 : index
    %c0_34 = arith.constant 0 : index
    %63 = vector.load %arg8[%c0_33, %c0_34] : memref<8x128xf32, #tpu.memory_space<vmem>>, vector<8x128xf32>
    tpu.vector_store %arg8[%c0_33, %c0_34], %62 {strides = array<i32>} : memref<8x128xf32, #tpu.memory_space<vmem>>, vector<8x128xf32>,
    %cst_35 = arith.constant dense<0.000000e+00> : vector<128xf32>
    %64 = vector.multi_reduction <add>, %62, %cst_35 [0] : vector<8x128xf32> to vector<128xf32>
    %65 = vector.shape_cast %64 : vector<128xf32> to vector<1x128xf32>
    %c0_36 = arith.constant 0 : index
    %c0_37 = arith.constant 0 : index
    %c0_38 = arith.constant 0 : index
    %66 = vector.load %arg9[%c0_36, %c0_37, %c0_38] : memref<1x1x128xf32, #tpu.memory_space<vmem>>, vector<1x1x128xf32>
    %67 = vector.shape_cast %66 : vector<1x1x128xf32> to vector<1x128xf32>
    %68 = vector.shape_cast %65 : vector<1x128xf32> to vector<1x1x128xf32>
    tpu.vector_store %arg9[%c0_36, %c0_37, %c0_38], %68 {strides = array<i32>} : memref<1x1x128xf32, #tpu.memory_space<vmem>>, vector<1x1x128xf32>,
    %69 = arith.mulf %62, %62 : vector<8x128xf32>
    %cst_39 = arith.constant dense<0.000000e+00> : vector<128xf32>
    %70 = vector.multi_reduction <add>, %69, %cst_39 [0] : vector<8x128xf32> to vector<128xf32>
    %71 = vector.shape_cast %70 : vector<128xf32> to vector<1x128xf32>
    %c0_40 = arith.constant 0 : index
    %c0_41 = arith.constant 0 : index
    %c0_42 = arith.constant 0 : index
    %72 = vector.load %arg10[%c0_40, %c0_41, %c0_42] : memref<1x1x128xf32, #tpu.memory_space<vmem>>, vector<1x1x128xf32>
    %73 = vector.shape_cast %72 : vector<1x1x128xf32> to vector<1x128xf32>
    %74 = vector.shape_cast %71 : vector<1x128xf32> to vector<1x1x128xf32>
    tpu.vector_store %arg10[%c0_40, %c0_41, %c0_42], %74 {strides = array<i32>} : memref<1x1x128xf32, #tpu.memory_space<vmem>>, vector<1x1x128xf32>,
    return
  }
  func.func @transform_0(%arg0: i32, %arg1: i32) -> (i32, i32) {
    %c3_i32 = arith.constant 3 : i32
    %0 = arith.muli %arg0, %c3_i32 : i32
    %1 = arith.addi %0, %arg1 : i32
    %c0_i32 = arith.constant 0 : i32
    %c0_i32_0 = arith.constant 0 : i32
    return %1, %c0_i32 : i32, i32
  }
  func.func @transform_1(%arg0: i32, %arg1: i32) -> (i32, i32) {
    %c3_i32 = arith.constant 3 : i32
    %0 = arith.muli %arg0, %c3_i32 : i32
    %c1_i32 = arith.constant 1 : i32
    %1 = arith.addi %arg1, %c1_i32 : i32
    %c1_i32_0 = arith.constant 1 : i32
    %2 = arith.muli %1, %c1_i32_0 : i32
    %3 = arith.addi %0, %2 : i32
    %c0_i32 = arith.constant 0 : i32
    %c0_i32_1 = arith.constant 0 : i32
    return %3, %c0_i32 : i32, i32
  }
  func.func @transform_2(%arg0: i32, %arg1: i32) -> (i32, i32, i32) {
    %c0_i32 = arith.constant 0 : i32
    %c0_i32_0 = arith.constant 0 : i32
    %c0_i32_1 = arith.constant 0 : i32
    %c0_i32_2 = arith.constant 0 : i32
    return %c0_i32, %c0_i32_0, %c0_i32_1 : i32, i32, i32
  }
  func.func @transform_3(%arg0: i32, %arg1: i32) -> (i32, i32) {
    %c0_i32 = arith.constant 0 : i32
    %c0_i32_0 = arith.constant 0 : i32
    %c0_i32_1 = arith.constant 0 : i32
    return %c0_i32, %c0_i32_0 : i32, i32
  }
  func.func @transform_4(%arg0: i32, %arg1: i32) -> (i32, i32) {
    %c0_i32 = arith.constant 0 : i32
    %c0_i32_0 = arith.constant 0 : i32
    %c0_i32_1 = arith.constant 0 : i32
    return %c0_i32, %c0_i32_0 : i32, i32
  }
  func.func @transform_5(%arg0: i32, %arg1: i32) -> (i32, i32) {
    %c0_i32 = arith.constant 0 : i32
    %c0_i32_0 = arith.constant 0 : i32
    %c0_i32_1 = arith.constant 0 : i32
    return %c0_i32, %c0_i32_0 : i32, i32
  }
  func.func @transform_6(%arg0: i32, %arg1: i32) -> (i32, i32) {
    %c2_i32 = arith.constant 2 : i32
    %0 = arith.muli %arg0, %c2_i32 : i32
    %1 = arith.addi %0, %arg1 : i32
    %c0_i32 = arith.constant 0 : i32
    %c0_i32_0 = arith.constant 0 : i32
    return %1, %c0_i32 : i32, i32
  }
  func.func @transform_7(%arg0: i32, %arg1: i32) -> (i32, i32, i32) {
    %c2_i32 = arith.constant 2 : i32
    %0 = arith.muli %arg0, %c2_i32 : i32
    %1 = arith.addi %0, %arg1 : i32
    %c0_i32 = arith.constant 0 : i32
    %c0_i32_0 = arith.constant 0 : i32
    %c0_i32_1 = arith.constant 0 : i32
    return %1, %c0_i32, %c0_i32_0 : i32, i32, i32
  }
  func.func @transform_8(%arg0: i32, %arg1: i32) -> (i32, i32, i32) {
    %c2_i32 = arith.constant 2 : i32
    %0 = arith.muli %arg0, %c2_i32 : i32
    %1 = arith.addi %0, %arg1 : i32
    %c0_i32 = arith.constant 0 : i32
    %c0_i32_0 = arith.constant 0 : i32
    %c0_i32_1 = arith.constant 0 : i32
    return %1, %c0_i32, %c0_i32_0 : i32, i32, i32
  }
}

module attributes {stable_mosaic.version = 11 : i64} {
  func.func @_bn_sigmoid_mul_kernel(%arg0: i32, %arg1: memref<32x128xf32, #tpu.memory_space<vmem>>, %arg2: memref<1x128xf32, #tpu.memory_space<vmem>>, %arg3: memref<1x128xf32, #tpu.memory_space<vmem>>, %arg4: memref<32x128xf32, #tpu.memory_space<vmem>>, %arg5: memref<32x128xf32, #tpu.memory_space<vmem>>) attributes {dimension_semantics = [#tpu.dimension_semantics<parallel>], iteration_bounds = array<i64: 1>, scalar_prefetch = 0 : i64, scratch_operands = 0 : i64, tpu.core_type = #tpu.core_type<tc>, window_params = [{transform_indices = @transform_0, window_bounds = array<i64: 32, 128>}, {pipeline_mode = #tpu.pipeline_mode<synchronous>, transform_indices = @transform_1, window_bounds = array<i64: 1, 128>}, {pipeline_mode = #tpu.pipeline_mode<synchronous>, transform_indices = @transform_2, window_bounds = array<i64: 1, 128>}, {transform_indices = @transform_3, window_bounds = array<i64: 32, 128>}, {transform_indices = @transform_4, window_bounds = array<i64: 32, 128>}]} {
    %c0 = arith.constant 0 : index
    %c0_0 = arith.constant 0 : index
    %0 = vector.load %arg4[%c0, %c0_0] : memref<32x128xf32, #tpu.memory_space<vmem>>, vector<32x128xf32>
    %c0_1 = arith.constant 0 : index
    %c0_2 = arith.constant 0 : index
    %1 = vector.load %arg1[%c0_1, %c0_2] : memref<32x128xf32, #tpu.memory_space<vmem>>, vector<32x128xf32>
    %c0_3 = arith.constant 0 : index
    %c0_4 = arith.constant 0 : index
    %2 = vector.load %arg2[%c0_3, %c0_4] : memref<1x128xf32, #tpu.memory_space<vmem>>, vector<1x128xf32>
    %3 = vector.broadcast %2 : vector<1x128xf32> to vector<32x128xf32>
    %4 = arith.mulf %1, %3 : vector<32x128xf32>
    %c0_5 = arith.constant 0 : index
    %c0_6 = arith.constant 0 : index
    %5 = vector.load %arg3[%c0_5, %c0_6] : memref<1x128xf32, #tpu.memory_space<vmem>>, vector<1x128xf32>
    %6 = vector.broadcast %5 : vector<1x128xf32> to vector<32x128xf32>
    %7 = arith.addf %4, %6 : vector<32x128xf32>
    %8 = arith.negf %7 : vector<32x128xf32>
    %9 = math.exp %8 : vector<32x128xf32>
    %cst = arith.constant 1.000000e+00 : f32
    %10 = vector.broadcast %cst : f32 to vector<32x128xf32>
    %11 = arith.addf %10, %9 : vector<32x128xf32>
    %12 = arith.divf %10, %11 : vector<32x128xf32>
    %13 = arith.mulf %0, %12 : vector<32x128xf32>
    %c0_7 = arith.constant 0 : index
    %c0_8 = arith.constant 0 : index
    %14 = vector.load %arg5[%c0_7, %c0_8] : memref<32x128xf32, #tpu.memory_space<vmem>>, vector<32x128xf32>
    tpu.vector_store %arg5[%c0_7, %c0_8], %13 {strides = array<i32>} : memref<32x128xf32, #tpu.memory_space<vmem>>, vector<32x128xf32>,
    return
  }
  func.func @transform_0(%arg0: i32) -> (i32, i32) {
    %c0_i32 = arith.constant 0 : i32
    %c0_i32_0 = arith.constant 0 : i32
    return %arg0, %c0_i32 : i32, i32
  }
  func.func @transform_1(%arg0: i32) -> (i32, i32) {
    %c0_i32 = arith.constant 0 : i32
    %c0_i32_0 = arith.constant 0 : i32
    %c0_i32_1 = arith.constant 0 : i32
    return %c0_i32, %c0_i32_0 : i32, i32
  }
  func.func @transform_2(%arg0: i32) -> (i32, i32) {
    %c0_i32 = arith.constant 0 : i32
    %c0_i32_0 = arith.constant 0 : i32
    %c0_i32_1 = arith.constant 0 : i32
    return %c0_i32, %c0_i32_0 : i32, i32
  }
  func.func @transform_3(%arg0: i32) -> (i32, i32) {
    %c0_i32 = arith.constant 0 : i32
    %c0_i32_0 = arith.constant 0 : i32
    return %arg0, %c0_i32 : i32, i32
  }
  func.func @transform_4(%arg0: i32) -> (i32, i32) {
    %c0_i32 = arith.constant 0 : i32
    %c0_i32_0 = arith.constant 0 : i32
    return %arg0, %c0_i32 : i32, i32
  }
}

</mosaic_0001>

<bundles_post_ra>
// kernel: _lambda_.4
= control target key start
LH: loop header
LB: loop body
LE: loop exit
PB: predicated region body
PF: predicated region fallthrough
CT: control target
= control target key end

     0   :  { %vm147_vm0 = vcmask 261120   ;;  %s507_s1 = inlined_call_operand.vmem [shape: f32[128,32], index: 1, kind: input, shape index: {}]   ;;  %s508_s0 = inlined_call_operand.vmem [shape: f32[32,128], index: 0, kind: input, shape index: {}]   ;;  %s509_s3 = inlined_call_operand.vmem [shape: f32[32,128], index: 3, kind: input, shape index: {}]   ;;  %s510_s2 = inlined_call_operand.vmem [shape: f32[1,32], index: 2, kind: input, shape index: {}]   ;;  %s511_s4 = inlined_call_operand.vmem [shape: f32[1,128], index: 4, kind: input, shape index: {}]   ;;  %s512_s5 = inlined_call_operand.vmem [shape: f32[32,128], index: 5, kind: output, shape index: {}]  }
   0x1   :  { %v24_v0 = vld [vmem:[%s507_s1] sm:$0xff]  ;;  %v25_v1 = vld [vmem:[%s507_s1 + $0x8] sm:$0xff]  ;;  %v26_v2 = vld [vmem:[%s507_s1 + $0x10] sm:$0xff] }
   0x2   :  { %v343_v3 = vpack.c.bf16 %v25_v1, %v24_v0  ;;  %v27_v4 = vld [vmem:[%s507_s1 + $0x18] sm:$0xff]  ;;  %v28_v6 = vld [vmem:[%s507_s1 + $0x20] sm:$0xff]  ;;  %v29_v7 = vld [vmem:[%s507_s1 + $0x28] sm:$0xff] }
   0x3   :  { %v347_v5 = vpack.c.bf16 %v27_v4, %v26_v2  ;;  %v351_v8 = vpack.c.bf16 %v29_v7, %v28_v6  ;;  %v434_v9 = vld [vmem:[%s508_s0] sm:$0xff]  ;;  %v30_v10 = vld [vmem:[%s507_s1 + $0x30] sm:$0xff]  ;;  %v31_v11 = vld [vmem:[%s507_s1 + $0x38] sm:$0xff] }
   0x4   :  { %344 = vmatprep.subr.bf16.mxu0 %v343_v3  ;;  %323 = vmatprep.mubr.f32.mxu0 %v434_v9  ;;  %v136_v12 = vld [vmem:[%s509_s3] sm:$0xff]  ;;  %v137_v13 = vld [vmem:[%s509_s3 + $0x8] sm:$0xff]  ;;  %v355_v15 = vpack.c.bf16 %v31_v11, %v30_v10  ;;  %v34_v19 = vld [vmem:[%s507_s1 + $0x50] sm:$0xff] }
   0x5   :  { %346 = vmatpush3.bf16.msra.mxu0 %v343_v3  ;;  %v375_v14 = vpack.c.bf16 %v137_v13, %v136_v12  ;;  %v32_v16 = vld [vmem:[%s507_s1 + $0x40] sm:$0xff]  ;;  %v33_v17 = vld [vmem:[%s507_s1 + $0x48] sm:$0xff]  ;;  %v35_v20 = vld [vmem:[%s507_s1 + $0x58] sm:$0xff] }
   0x6   :  { %348 = vmatprep.subr.bf16.mxu0 %v347_v5  ;;  %v359_v18 = vpack.c.bf16 %v33_v17, %v32_v16  ;;  %v363_v21 = vpack.c.bf16 %v35_v20, %v34_v19  ;;  %v36_v22 = vld [vmem:[%s507_s1 + $0x60] sm:$0xff]  ;;  %v37_v23 = vld [vmem:[%s507_s1 + $0x68] sm:$0xff]  ;;  %v38_v25 = vld [vmem:[%s507_s1 + $0x70] sm:$0xff] }
   0x7   :  { %376 = vmatprep.subr.bf16.mxu1 %v375_v14  ;;  %v367_v24 = vpack.c.bf16 %v37_v23, %v36_v22  ;;  %v39_v26 = vld [vmem:[%s507_s1 + $0x78] sm:$0xff]  ;;  %v21_v28 = vld [vmem:[%s508_s0 + $0x8] sm:$0xff]  ;;  %v22_v29 = vld [vmem:[%s508_s0 + $0x10] sm:$0xff] }
   0x8   :  { %378 = vmatpush3.bf16.msra.mxu1 %v375_v14  ;;  %v371_v27 = vpack.c.bf16 %v39_v26, %v38_v25  ;;  %v23_v30 = vld [vmem:[%s508_s0 + $0x18] sm:$0xff]  ;;  %v138_v31 = vld [vmem:[%s509_s3 + $0x10] sm:$0xff]  ;;  %v257_v34 = vld [vmem:[%s510_s2] ss:$0 sm:$0xff] }
   0x9   :  { %350 = vmatpush3.bf16.msra.mxu0 %v347_v5  ;;  %v139_v32 = vld [vmem:[%s509_s3 + $0x18] sm:$0xff]  ;;  %v258_v47 = vld [vmem:[%s511_s4] ss:$0 sm:$0xff] }
   0xa   :  { %352 = vmatprep.subr.bf16.mxu0 %v351_v8  ;;  %v379_v33 = vpack.c.bf16 %v139_v32, %v138_v31 }
   0xc   :  { %380 = vmatprep.subr.bf16.mxu1 %v379_v33 }
   0xd   :  { %354 = vmatpush3.bf16.msra.mxu0 %v351_v8  ;;  %382 = vmatpush3.bf16.msra.mxu1 %v379_v33 }
   0xe   :  { %356 = vmatprep.subr.bf16.mxu0 %v355_v15 }
  0x11   :  { %358 = vmatpush3.bf16.msra.mxu0 %v355_v15 }
  0x12   :  { %360 = vmatprep.subr.bf16.mxu0 %v359_v18 }
  0x15   :  { %362 = vmatpush3.bf16.msra.mxu0 %v359_v18 }
  0x16   :  { %364 = vmatprep.subr.bf16.mxu0 %v363_v21 }
  0x19   :  { %366 = vmatpush3.bf16.msra.mxu0 %v363_v21 }
  0x1a   :  { %368 = vmatprep.subr.bf16.mxu0 %v367_v24 }
  0x1d   :  { %370 = vmatpush3.bf16.msra.mxu0 %v367_v24 }
  0x1e   :  { %372 = vmatprep.subr.bf16.mxu0 %v371_v27 }
  0x21   :  { %374 = vmatpush3.bf16.msra.mxu0 %v371_v27 }
  0x24   :  { %324 = vmatmul.mubr.f32.vlgmr.msra.gmra.mrb[0].mxu0 %v21_v28 }
  0x25   :  { %326 = vmatprep.mubr.f32.mxu0 %v22_v29 }
  0x28   :  { %327 = vmatmul.mubr.f32.gmra.mrb[2].mxu0 %v23_v30 }
  0xf7   :  { %v325_v35 = vpop.f32.mrb[0].mxu0 }
  0xf8   :  { %v119_v36 = vadd.f32 %v325_v35, %v257_v34  ;;  %v113_v37 = vpop.f32.mrb[1].mxu0 }
  0xf9   :  { %v114_v38 = vadd.f32 %v257_v34, %v113_v37 }
  0xfa   :  { %v133_v41 = vmax.f32 %v119_v36, 0.0 }
  0xfb   :  { %v132_v39 = vmax.f32 %v114_v38, 0.0  ;;  %v328_v40 = vpop.f32.mrb[2].mxu0 }
  0xfc   :  { %v129_v42 = vadd.f32 %v328_v40, %v257_v34  ;;  %v123_v43 = vpop.f32.mrb[3].mxu0 }
  0xfd   :  { %v124_v44 = vadd.f32 %v257_v34, %v123_v43  ;;  %337 = vmatprep.mubr.msk.f32.mxu1 %vm147_vm0, %v132_v39 }
  0xfe   :  { %338 = vmatmul.mubr.msk.f32.vlgmr.msra.gmra.mrb[0].mxu1 %vm147_vm0, %v133_v41  ;;  %v135_v46 = vmax.f32 %v129_v42, 0.0 }
  0xff   :  { %v134_v45 = vmax.f32 %v124_v44, 0.0 }
 0x101   :  { %340 = vmatprep.mubr.msk.f32.mxu1 %vm147_vm0, %v134_v45 }
 0x102   :  { %341 = vmatmul.mubr.msk.f32.gmra.mrb[2].mxu1 %vm147_vm0, %v135_v46 }
 0x1d1   :  { %v339_v48 = vpop.f32.mrb[0].mxu1 }
 0x1d2   :  { %v232_v49 = vadd.f32 %v339_v48, %v258_v47  ;;  %v226_v50 = vpop.f32.mrb[1].mxu1 }
 0x1d3   :  { %v227_v51 = vadd.f32 %v258_v47, %v226_v50 }
 0x1d4   :  { %v246_v52 = vmul.f32 %v232_v49, %v21_v28 }
 0x1d5   :  { %v245_v53 = vmul.f32 %v227_v51, %v434_v9  ;;  %v342_v54 = vpop.f32.mrb[2].mxu1 }
 0x1d6   :  { %250 = vst [vmem:[%s512_s5 + $0x8] sm:$0xff] %v246_v52  ;;  %v242_v55 = vadd.f32 %v342_v54, %v258_v47  ;;  %v236_v56 = vpop.f32.mrb[3].mxu1 }
 0x1d7   :  { %249 = vst [vmem:[%s512_s5] sm:$0xff] %v245_v53  ;;  %v237_v57 = vadd.f32 %v258_v47, %v236_v56 }
 0x1d8   :  { %v248_v58 = vmul.f32 %v242_v55, %v23_v30 }
 0x1d9   :  { %v247_v59 = vmul.f32 %v237_v57, %v22_v29 }
 0x1da   :  { %252 = vst [vmem:[%s512_s5 + $0x18] sm:$0xff] %v248_v58 }
 0x1db   :  { %251 = vst [vmem:[%s512_s5 + $0x10] sm:$0xff] %v247_v59 }

// kernel: _lambda_.5
= control target key start
LH: loop header
LB: loop body
LE: loop exit
PB: predicated region body
PF: predicated region fallthrough
CT: control target
= control target key end

     0   :  { %s2186_s27 = smov 0   ;;  %s2188_s28 = smov 0   ;;  %s3015_s0 = inlined_call_operand.vmem [shape: f32[48,256], index: 0, kind: input, shape index: {}, may-alias: {0,1}]   ;;  %s3016_s1 = inlined_call_operand.vmem [shape: f32[48,256], index: 1, kind: input, shape index: {}, may-alias: {0,1}]   ;;  %s3017_s2 = inlined_call_operand.vmem [shape: f32[7,256,128], index: 2, kind: input, shape index: {}]   ;;  %s3018_s3 = inlined_call_operand.vmem [shape: f32[1,128], index: 3, kind: input, shape index: {}]   ;;  %s3019_s4 = inlined_call_operand.vmem [shape: f32[1,256], index: 4, kind: input, shape index: {}, may-alias: {4,5}]   ;;  %s3020_s5 = inlined_call_operand.vmem [shape: f32[1,256], index: 5, kind: input, shape index: {}, may-alias: {4,5}]   ;;  %s3021_s6 = inlined_call_operand.vmem [shape: f32[32,128], index: 6, kind: output, shape index: {0}]   ;;  %s3022_s7 = inlined_call_operand.vmem [shape: f32[4,1,128], index: 7, kind: output, shape index: {1}]   ;;  %s3023_s8 = inlined_call_operand.vmem [shape: f32[4,1,128], index: 8, kind: output, shape index: {2}]  }
   0x1   :  { %s2190_s29 = smov 0   ;;  %s2192_s30 = smov 0  }
   0x2   :  { %s2194_s4 = smov 0  }
   0x3 LB: > { %s28_s5 = sadd.s32 1, %s2131_s29  ;;  %s31_s9 = sadd.s32 1, %s2135_s30  ;;  %s2139_s4 = sphi %s2194_s4, %s19_s4   ;;  %s2135_s30 = sphi %s2192_s30, %s3027_s30   ;;  %s2131_s29 = sphi %s2190_s29, %s3026_s29   ;;  %s2127_s28 = sphi %s2188_s28, %s3025_s28   ;;  %s2123_s27 = sphi %s2186_s27, %s3024_s27  }
   0x4   : > { %p29_p0 = scmp.ge.s32.totalorder %s28_s5, 2  ;;  %p1386_p1 = scmp.ge.s32.totalorder %s2139_s4, 1 }
   0x5   : > { %p321_p2 = scmp.lt.s32.totalorder %s2139_s4, 5 }
   0x6   : > { %s3029_s5 = smov (%p29_p0, %s28_s5), 0  ;;  %s3031_s9 = smov (!%p29_p0, %s31_s9), %s2135_s30 }
   0x7   : > { %p322_p3 = pnand %p1386_p1, %p321_p2  ;;  %p33_p4 = scmp.ge.s32.totalorder %s3031_s9, 2 }
   0x8   : > { %v446_v0 = vld [vmem:[%s3017_s2 + $0x80] sm:$0xff] (!%p322_p3)  ;;  %v447_v1 = vld [vmem:[%s3017_s2 + $0x88] sm:$0xff] (!%p322_p3)  ;;  %s376_s16 = smul.u32 (!%p322_p3), 3, %s2127_s28  ;;  %v448_v11 = vld [vmem:[%s3017_s2 + $0x90] sm:$0xff] (!%p322_p3)  ;;  %s386_s12 = sadd.s32 (!%p322_p3), 1, %s2123_s27  ;;  %vm570_vm0 = vcmask (!%p322_p3), 1046528  }
   0x9   : > { %s3033_s9 = smov (%p33_p4, %s3031_s9), 0  ;;  %325 = sbr.rel (%p322_p3) target bundleno = 372 (0x174), region = 44 }
   0xa   : > { %v430_v2 = vld [vmem:[%s3017_s2] sm:$0xff] (!%p322_p3)  ;;  %v1837_v3 = vpack.c.bf16 (!%p322_p3), %v447_v1, %v446_v0  ;;  %v431_v4 = vld [vmem:[%s3017_s2 + $0x8] sm:$0xff] (!%p322_p3)  ;;  %v449_v13 = vld [vmem:[%s3017_s2 + $0x98] sm:$0xff] (!%p322_p3)  ;;  %s2261_s20 = sadd.s32 (!%p322_p3), %s2123_s27, %s376_s16  ;;  %s2283_s18 = sadd.s32 (!%p322_p3), %s386_s12, %s376_s16  ;;  %vm683_vm1 = vcmask (!%p322_p3), 1045504   ;;  %vm796_vm2 = vcmask (!%p322_p3), 1044480   ;;  %vm1022_vm3 = vcmask (!%p322_p3), 1042432  }
   0xb   : > { %v1412_v5 = vld [vmem:[%s3017_s2 + $0x180] sm:$0xff] (!%p322_p3)  ;;  %v1413_v6 = vld [vmem:[%s3017_s2 + $0x188] sm:$0xff] (!%p322_p3)  ;;  %v1839_v7 = vpack.c.bf16 (!%p322_p3), %v431_v4, %v430_v2  ;;  %v432_v14 = vld [vmem:[%s3017_s2 + $0x10] sm:$0xff] (!%p322_p3)  ;;  %v1841_v16 = vpack.c.bf16 (!%p322_p3), %v449_v13, %v448_v11  ;;  %p378_p5 = scmp.lt.s32.totalorder (!%p322_p3), %s2261_s20, 5  ;;  %p388_p6 = scmp.lt.s32.totalorder (!%p322_p3), %s2283_s18, 5  ;;  %vm1135_vm4 = vcmask (!%p322_p3), 1041408  }
   0xc   : > { %v1869_v8 = vpack.c.bf16 (!%p322_p3), %v1413_v6, %v1412_v5  ;;  %v1396_v9 = vld [vmem:[%s3017_s2 + $0x100] sm:$0xff] (!%p322_p3)  ;;  %v1397_v10 = vld [vmem:[%s3017_s2 + $0x108] sm:$0xff] (!%p322_p3)  ;;  %1838 = vmatprep.subr.bf16.mxu0 (!%p322_p3), %v1837_v3  ;;  %v433_v15 = vld [vmem:[%s3017_s2 + $0x18] sm:$0xff] (!%p322_p3)  ;;  %vm909_vm5 = vcmask (!%p322_p3), 1043456   ;;  %s1391_s12 = sshll.u32 (!%p322_p3), %s2127_s28, 1 }
   0xd   : > { %v1871_v12 = vpack.c.bf16 (!%p322_p3), %v1397_v10, %v1396_v9  ;;  %1840 = vmatpush3.bf16.msra.mxu0 (!%p322_p3), %v1839_v7  ;;  %v1843_v17 = vpack.c.bf16 (!%p322_p3), %v433_v15, %v432_v14  ;;  %v1414_v18 = vld [vmem:[%s3017_s2 + $0x190] sm:$0xff] (!%p322_p3)  ;;  %v1415_v19 = vld [vmem:[%s3017_s2 + $0x198] sm:$0xff] (!%p322_p3)  ;;  %v450_v23 = vld [vmem:[%s3017_s2 + $0xa0] sm:$0xff] (!%p322_p3)  ;;  %s397_s10 = sadd.s32 (!%p322_p3), %s2123_s27, %s1391_s12 }
   0xe   : > { %1870 = vmatprep.subr.bf16.mxu1 (!%p322_p3), %v1869_v8  ;;  %v1398_v20 = vld [vmem:[%s3017_s2 + $0x110] sm:$0xff] (!%p322_p3)  ;;  %v1873_v21 = vpack.c.bf16 (!%p322_p3), %v1415_v19, %v1414_v18  ;;  %v1399_v22 = vld [vmem:[%s3017_s2 + $0x118] sm:$0xff] (!%p322_p3)  ;;  %v451_v24 = vld [vmem:[%s3017_s2 + $0xa8] sm:$0xff] (!%p322_p3)  ;;  %1842 = vmatprep.subr.bf16.mxu0 (!%p322_p3), %v1841_v16  ;;  %p398_p7 = scmp.lt.s32.totalorder (!%p322_p3), %s397_s10, 3 }
   0xf   : > { %1872 = vmatpush3.bf16.msra.mxu1 (!%p322_p3), %v1871_v12  ;;  %v1875_v25 = vpack.c.bf16 (!%p322_p3), %v1399_v22, %v1398_v20  ;;  %v1845_v26 = vpack.c.bf16 (!%p322_p3), %v451_v24, %v450_v23  ;;  %v434_v27 = vld [vmem:[%s3017_s2 + $0x20] sm:$0xff] (!%p322_p3)  ;;  %v435_v28 = vld [vmem:[%s3017_s2 + $0x28] sm:$0xff] (!%p322_p3)  ;;  %v452_v35 = vld [vmem:[%s3017_s2 + $0xb0] sm:$0xff] (!%p322_p3) }
  0x10   : > { %v1416_v29 = vld [vmem:[%s3017_s2 + $0x1a0] sm:$0xff]  ;;  %1874 = vmatprep.subr.bf16.mxu1 %v1873_v21  ;;  %v1417_v30 = vld [vmem:[%s3017_s2 + $0x1a8] sm:$0xff]  ;;  %v1847_v33 = vpack.c.bf16 %v435_v28, %v434_v27  ;;  %v453_v36 = vld [vmem:[%s3017_s2 + $0xb8] sm:$0xff]  ;;  %s3035_s20 = smov (!%p378_p5, %s2261_s20), 5  ;;  %s3037_s18 = smov (!%p388_p6, %s2283_s18), 5 }
  0x11   : > { %v1400_v31 = vld [vmem:[%s3017_s2 + $0x120] sm:$0xff]  ;;  %v1401_v32 = vld [vmem:[%s3017_s2 + $0x128] sm:$0xff]  ;;  %1844 = vmatpush3.bf16.msra.mxu0 %v1843_v17  ;;  %v1877_v34 = vpack.c.bf16 %v1417_v30, %v1416_v29  ;;  %v436_v37 = vld [vmem:[%s3017_s2 + $0x30] sm:$0xff]  ;;  %v1849_v39 = vpack.c.bf16 %v453_v36, %v452_v35  ;;  %s1590_s23 = sshll.u32 %s3035_s20, 4  ;;  %s1591_s26 = sshll.u32 %s3037_s18, 4 }
  0x12   : > { %1846 = vmatprep.subr.bf16.mxu0 %v1845_v26  ;;  %v1879_v38 = vpack.c.bf16 %v1401_v32, %v1400_v31  ;;  %v437_v40 = vld [vmem:[%s3017_s2 + $0x38] sm:$0xff]  ;;  %v1418_v41 = vld [vmem:[%s3017_s2 + $0x1b0] sm:$0xff]  ;;  %v454_v46 = vld [vmem:[%s3017_s2 + $0xc0] sm:$0xff]  ;;  %s2389_s18 = scalar_lea.vmem %s3015_s0, %s1590_s23  ;;  %s2409_s15 = scalar_lea.vmem %s3016_s1, %s1591_s26 }
  0x13   : > { %1876 = vmatpush3.bf16.msra.mxu1 %v1875_v25  ;;  %v1419_v42 = vld [vmem:[%s3017_s2 + $0x1b8] sm:$0xff]  ;;  %v1402_v44 = vld [vmem:[%s3017_s2 + $0x130] sm:$0xff]  ;;  %v455_v47 = vld [vmem:[%s3017_s2 + $0xc8] sm:$0xff]  ;;  %v1851_v48 = vpack.c.bf16 %v437_v40, %v436_v37  ;;  %s3039_s10 = smov (!%p398_p7, %s397_s10), 3 }
  0x14   : > { %1878 = vmatprep.subr.bf16.mxu1 %v1877_v34  ;;  %v1881_v43 = vpack.c.bf16 %v1419_v42, %v1418_v41  ;;  %v1403_v45 = vld [vmem:[%s3017_s2 + $0x138] sm:$0xff]  ;;  %v1420_v49 = vld [vmem:[%s3017_s2 + $0x1c0] sm:$0xff]  ;;  %v1421_v50 = vld [vmem:[%s3017_s2 + $0x1c8] sm:$0xff]  ;;  %v1853_v52 = vpack.c.bf16 %v455_v47, %v454_v46  ;;  %s1392_s11 = sshll.u32 %s3039_s10, 3  ;;  %s408_s13 = scalar_lea.vmem %s3022_s7, %s3039_s10 }
  0x15   : > { %1848 = vmatpush3.bf16.msra.mxu0 %v1847_v33  ;;  %v1883_v51 = vpack.c.bf16 %v1403_v45, %v1402_v44  ;;  %v438_v53 = vld [vmem:[%s3017_s2 + $0x40] sm:$0xff]  ;;  %v439_v54 = vld [vmem:[%s3017_s2 + $0x48] sm:$0xff]  ;;  %v1885_v56 = vpack.c.bf16 %v1421_v50, %v1420_v49  ;;  %v456_v58 = vld [vmem:[%s3017_s2 + $0xd0] sm:$0xff]  ;;  %s415_s17 = scalar_lea.vmem %s3023_s8, %s3039_s10 }
  0x16   : > { %1850 = vmatprep.subr.bf16.mxu0 %v1849_v39  ;;  %v1404_v55 = vld [vmem:[%s3017_s2 + $0x140] sm:$0xff]  ;;  %v1405_v57 = vld [vmem:[%s3017_s2 + $0x148] sm:$0xff]  ;;  %v457_v59 = vld [vmem:[%s3017_s2 + $0xd8] sm:$0xff]  ;;  %v1855_v62 = vpack.c.bf16 %v439_v54, %v438_v53 }
  0x17   : > { %1880 = vmatpush3.bf16.msra.mxu1 %v1879_v38  ;;  %v1422_v60 = vld [vmem:[%s3017_s2 + $0x1d0] sm:$0xff]  ;;  %v1423_v61 = vld [vmem:[%s3017_s2 + $0x1d8] sm:$0xff]  ;;  %v1887_v63 = vpack.c.bf16 %v1405_v57, %v1404_v55  ;;  %v1857_v0 = vpack.c.bf16 %v457_v59, %v456_v58  ;;  %v458_v6 = vld [vmem:[%s3017_s2 + $0xe0] sm:$0xff] }
  0x18   : > { %1882 = vmatprep.subr.bf16.mxu1 %v1881_v43  ;;  %v440_v1 = vld [vmem:[%s3017_s2 + $0x50] sm:$0xff]  ;;  %v441_v2 = vld [vmem:[%s3017_s2 + $0x58] sm:$0xff]  ;;  %v1889_v4 = vpack.c.bf16 %v1423_v61, %v1422_v60  ;;  %v459_v7 = vld [vmem:[%s3017_s2 + $0xe8] sm:$0xff] }
  0x19   : > { %1852 = vmatpush3.bf16.msra.mxu0 %v1851_v48  ;;  %v1406_v3 = vld [vmem:[%s3017_s2 + $0x150] sm:$0xff]  ;;  %v1407_v5 = vld [vmem:[%s3017_s2 + $0x158] sm:$0xff]  ;;  %v1424_v8 = vld [vmem:[%s3017_s2 + $0x1e0] sm:$0xff]  ;;  %v1859_v10 = vpack.c.bf16 %v441_v2, %v440_v1  ;;  %v1861_v14 = vpack.c.bf16 %v459_v7, %v458_v6 }
  0x1a   : > { %1854 = vmatprep.subr.bf16.mxu0 %v1853_v52  ;;  %v1425_v9 = vld [vmem:[%s3017_s2 + $0x1e8] sm:$0xff]  ;;  %v442_v11 = vld [vmem:[%s3017_s2 + $0x60] sm:$0xff]  ;;  %v1891_v13 = vpack.c.bf16 %v1407_v5, %v1406_v3  ;;  %v460_v20 = vld [vmem:[%s3017_s2 + $0xf0] sm:$0xff] }
  0x1b   : > { %1884 = vmatpush3.bf16.msra.mxu1 %v1883_v51  ;;  %v2415_v12 = vld [vmem:[%s2389_s18 + $0x8] sm:$0xff]  ;;  %v1408_v16 = vld [vmem:[%s3017_s2 + $0x160] sm:$0xff]  ;;  %v1893_v19 = vpack.c.bf16 %v1425_v9, %v1424_v8  ;;  %v461_v21 = vld [vmem:[%s3017_s2 + $0xf8] sm:$0xff] }
  0x1c   : > { %1886 = vmatprep.subr.bf16.mxu1 %v1885_v56  ;;  %v443_v15 = vld [vmem:[%s3017_s2 + $0x68] sm:$0xff]  ;;  %v574_v18 = vrot.slane %v2415_v12, 1  ;;  %526 = vmatprep.mubr.f32.mxu0 %v2415_v12  ;;  %v1426_v23 = vld [vmem:[%s3017_s2 + $0x1f0] sm:$0xff]  ;;  %v1427_v24 = vld [vmem:[%s3017_s2 + $0x1f8] sm:$0xff]  ;;  %v1865_v30 = vpack.c.bf16 %v461_v21, %v460_v20  ;;  %v687_v53 = vrot.slane %v2415_v12, 2  ;;  %v800_v54 = vrot.slane %v2415_v12, 3 }
  0x1d   : > { %1856 = vmatpush3.bf16.msra.mxu0 %v1855_v62  ;;  %v1409_v17 = vld [vmem:[%s3017_s2 + $0x168] sm:$0xff]  ;;  %v1863_v26 = vpack.c.bf16 %v443_v15, %v442_v11  ;;  %v444_v27 = vld [vmem:[%s3017_s2 + $0x70] sm:$0xff]  ;;  %v445_v28 = vld [vmem:[%s3017_s2 + $0x78] sm:$0xff]  ;;  %v1897_v35 = vpack.c.bf16 %v1427_v24, %v1426_v23 }
  0x1e   : > { %1858 = vmatprep.subr.bf16.mxu0 %v1857_v0  ;;  %v2435_v22 = vld [vmem:[%s2409_s15 + $0x8] sm:$0x3f]  ;;  %v1895_v29 = vpack.c.bf16 %v1409_v17, %v1408_v16  ;;  %v1410_v31 = vld [vmem:[%s3017_s2 + $0x170] sm:$0xff]  ;;  %v2454_v32 = vld [vmem:[%s2389_s18] sm:$0xff]  ;;  %v1867_v41 = vpack.c.bf16 %v445_v28, %v444_v27  ;;  %v1139_v0 = vrot.slane %v2415_v12, 6  ;;  %s401_s18 = scalar_lea.vmem %s3021_s6, %s1392_s11 }
  0x1f   : > { %1888 = vmatpush3.bf16.msra.mxu1 %v1887_v63  ;;  %v575_v25 = vrot.slane %v2435_v22, 1  ;;  %v2458_v34 = vld [vmem:[%s2409_s15] sm:$0x3f]  ;;  %v1411_v36 = vld [vmem:[%s3017_s2 + $0x178] sm:$0xff]  ;;  %v1445_v38 = vld [vmem:[%s3017_s2 + $0x288] sm:$0xff]  ;;  %v571_v44 = vrot.slane %v2454_v32, 1 }
  0x20   : > { %1890 = vmatprep.subr.bf16.mxu1 %v1889_v4  ;;  %v1444_v37 = vld [vmem:[%s3017_s2 + $0x280] sm:$0xff]  ;;  %v1477_v40 = vld [vmem:[%s3017_s2 + $0x388] sm:$0xff]  ;;  %v572_v45 = vrot.slane %v2458_v34, 1  ;;  %v1899_v46 = vpack.c.bf16 %v1411_v36, %v1410_v31  ;;  %v1446_v51 = vld [vmem:[%s3017_s2 + $0x290] sm:$0xff]  ;;  %v688_v58 = vrot.slane %v2435_v22, 2  ;;  %v1023_v59 = vrot.slane %v2454_v32, 5 }
  0x21   : > { %1860 = vmatpush3.bf16.msra.mxu0 %v1859_v10  ;;  %v576_v33 = vsel %vm570_vm0, %v574_v18, %v575_v25  ;;  %v1476_v39 = vld [vmem:[%s3017_s2 + $0x380] sm:$0xff]  ;;  %v1429_v43 = vld [vmem:[%s3017_s2 + $0x208] sm:$0xff]  ;;  %v1901_v47 = vpack.c.bf16 %v1445_v38, %v1444_v37  ;;  %v1447_v52 = vld [vmem:[%s3017_s2 + $0x298] sm:$0xff]  ;;  %v1024_v60 = vrot.slane %v2458_v34, 5  ;;  %v801_v63 = vrot.slane %v2435_v22, 3 }
  0x22   : > { %1862 = vmatprep.subr.bf16.mxu0 %v1861_v14  ;;  %643 = vmatprep.mubr.f32.mxu1 %v576_v33  ;;  %v1428_v42 = vld [vmem:[%s3017_s2 + $0x200] sm:$0xff]  ;;  %v1461_v49 = vld [vmem:[%s3017_s2 + $0x308] sm:$0xff]  ;;  %v1933_v50 = vpack.c.bf16 %v1477_v40, %v1476_v39  ;;  %v1478_v56 = vld [vmem:[%s3017_s2 + $0x390] sm:$0xff]  ;;  %v573_v61 = vsel %vm570_vm0, %v571_v44, %v572_v45  ;;  %v1905_v1 = vpack.c.bf16 %v1447_v52, %v1446_v51  ;;  %v1140_v6 = vrot.slane %v2435_v22, 6 }
  0x23   : > { %1892 = vmatpush3.bf16.msra.mxu1 %v1891_v13  ;;  %v1460_v48 = vld [vmem:[%s3017_s2 + $0x300] sm:$0xff]  ;;  %v1903_v55 = vpack.c.bf16 %v1429_v43, %v1428_v42  ;;  %v1479_v57 = vld [vmem:[%s3017_s2 + $0x398] sm:$0xff]  ;;  %v1430_v2 = vld [vmem:[%s3017_s2 + $0x210] sm:$0xff]  ;;  %v2519_v5 = vsel %vm1022_vm3, %v1023_v59, %v1024_v60  ;;  %v1136_v7 = vrot.slane %v2454_v32, 6  ;;  %v1137_v13 = vrot.slane %v2458_v34, 6 }
  0x24   : > { %1894 = vmatprep.subr.bf16.mxu1 %v1893_v19  ;;  %v1935_v62 = vpack.c.bf16 %v1461_v49, %v1460_v48  ;;  %v1431_v3 = vld [vmem:[%s3017_s2 + $0x218] sm:$0xff]  ;;  %v1462_v4 = vld [vmem:[%s3017_s2 + $0x310] sm:$0xff]  ;;  %v1937_v8 = vpack.c.bf16 %v1479_v57, %v1478_v56  ;;  %v1448_v10 = vld [vmem:[%s3017_s2 + $0x2a0] sm:$0xff]  ;;  %v689_v16 = vsel %vm683_vm1, %v687_v53, %v688_v58  ;;  %v2542_v17 = vsel %vm1135_vm4, %v1139_v0, %v1140_v6 }
  0x25   : > { %1864 = vmatpush3.bf16.msra.mxu0 %v1863_v26  ;;  %v1463_v9 = vld [vmem:[%s3017_s2 + $0x318] sm:$0xff]  ;;  %v1449_v11 = vld [vmem:[%s3017_s2 + $0x2a8] sm:$0xff]  ;;  %v1480_v14 = vld [vmem:[%s3017_s2 + $0x3a0] sm:$0xff]  ;;  %v1907_v18 = vpack.c.bf16 %v1431_v3, %v1430_v2  ;;  %v802_v19 = vsel %vm796_vm2, %v800_v54, %v801_v63  ;;  %v2546_v20 = vsel %vm1135_vm4, %v1136_v7, %v1137_v13 }
  0x26   : > { %1866 = vmatprep.subr.bf16.mxu0 %v1865_v30  ;;  %v1481_v15 = vld [vmem:[%s3017_s2 + $0x3a8] sm:$0xff]  ;;  %v1939_v21 = vpack.c.bf16 %v1463_v9, %v1462_v4  ;;  %v1909_v23 = vpack.c.bf16 %v1449_v11, %v1448_v10  ;;  %v1432_v24 = vld [vmem:[%s3017_s2 + $0x220] sm:$0xff]  ;;  %v1451_v30 = vld [vmem:[%s3017_s2 + $0x2b8] sm:$0xff] }
  0x27   : > { %1896 = vmatpush3.bf16.msra.mxu1 %v1895_v29  ;;  %v1433_v25 = vld [vmem:[%s3017_s2 + $0x228] sm:$0xff]  ;;  %v1464_v26 = vld [vmem:[%s3017_s2 + $0x320] sm:$0xff]  ;;  %v1941_v27 = vpack.c.bf16 %v1481_v15, %v1480_v14  ;;  %v1450_v29 = vld [vmem:[%s3017_s2 + $0x2b0] sm:$0xff] }
  0x28   : > { %1898 = vmatprep.subr.bf16.mxu1 %v1897_v35  ;;  %v1465_v28 = vld [vmem:[%s3017_s2 + $0x328] sm:$0xff]  ;;  %v1482_v31 = vld [vmem:[%s3017_s2 + $0x3b0] sm:$0xff]  ;;  %v1483_v33 = vld [vmem:[%s3017_s2 + $0x3b8] sm:$0xff]  ;;  %v1911_v35 = vpack.c.bf16 %v1433_v25, %v1432_v24  ;;  %v1913_v37 = vpack.c.bf16 %v1451_v30, %v1450_v29 }
  0x29   : > { %1868 = vmatpush3.bf16.msra.mxu0 %v1867_v41  ;;  %v1943_v36 = vpack.c.bf16 %v1465_v28, %v1464_v26  ;;  %v1434_v38 = vld [vmem:[%s3017_s2 + $0x230] sm:$0xff]  ;;  %v1435_v39 = vld [vmem:[%s3017_s2 + $0x238] sm:$0xff]  ;;  %v1945_v41 = vpack.c.bf16 %v1483_v33, %v1482_v31  ;;  %v1452_v43 = vld [vmem:[%s3017_s2 + $0x2c0] sm:$0xff] }
  0x2a   : > { %1902 = vmatprep.subr.bf16.mxu0 %v1901_v47  ;;  %v1466_v40 = vld [vmem:[%s3017_s2 + $0x330] sm:$0xff]  ;;  %v1467_v42 = vld [vmem:[%s3017_s2 + $0x338] sm:$0xff]  ;;  %v1453_v44 = vld [vmem:[%s3017_s2 + $0x2c8] sm:$0xff]  ;;  %v1915_v47 = vpack.c.bf16 %v1435_v39, %v1434_v38  ;;  %v684_v39 = vrot.slane %v2454_v32, 2 }
  0x2b   : > { %1900 = vmatpush3.bf16.msra.mxu1 %v1899_v46  ;;  %v1484_v45 = vld [vmem:[%s3017_s2 + $0x3c0] sm:$0xff]  ;;  %v1485_v46 = vld [vmem:[%s3017_s2 + $0x3c8] sm:$0xff]  ;;  %v1947_v48 = vpack.c.bf16 %v1467_v42, %v1466_v40  ;;  %v1917_v49 = vpack.c.bf16 %v1453_v44, %v1452_v43  ;;  %v1455_v56 = vld [vmem:[%s3017_s2 + $0x2d8] sm:$0xff]  ;;  %v685_v40 = vrot.slane %v2458_v34, 2 }
  0x2c   : > { %1934 = vmatprep.subr.bf16.mxu1 %v1933_v50  ;;  %527 = vmatmul.mubr.f32.vlgmr.msra.gmra.mrb[0].mxu0 %v2454_v32  ;;  %v1436_v50 = vld [vmem:[%s3017_s2 + $0x240] sm:$0xff]  ;;  %v1437_v51 = vld [vmem:[%s3017_s2 + $0x248] sm:$0xff]  ;;  %v1949_v53 = vpack.c.bf16 %v1485_v46, %v1484_v45  ;;  %v1486_v57 = vld [vmem:[%s3017_s2 + $0x3d0] sm:$0xff]  ;;  %v797_v45 = vrot.slane %v2454_v32, 3  ;;  %v798_v46 = vrot.slane %v2458_v34, 3 }
  0x2d   : > { %1904 = vmatpush3.bf16.msra.mxu0 %v1903_v55  ;;  %756 = vmatprep.mubr.f32.mxu0 %v689_v16  ;;  %v1468_v52 = vld [vmem:[%s3017_s2 + $0x340] sm:$0xff]  ;;  %v1469_v54 = vld [vmem:[%s3017_s2 + $0x348] sm:$0xff]  ;;  %v1454_v55 = vld [vmem:[%s3017_s2 + $0x2d0] sm:$0xff]  ;;  %v1919_v59 = vpack.c.bf16 %v1437_v51, %v1436_v50 }
  0x2e   : > { %644 = vmatmul.mubr.f32.vlgmr.msra.gmra.mrb[0].mxu1 %v573_v61  ;;  %1906 = vmatprep.subr.bf16.mxu0 %v1905_v1  ;;  %v1487_v58 = vld [vmem:[%s3017_s2 + $0x3d8] sm:$0xff]  ;;  %v1951_v60 = vpack.c.bf16 %v1469_v54, %v1468_v52  ;;  %v1921_v61 = vpack.c.bf16 %v1455_v56, %v1454_v55  ;;  %v1470_v0 = vld [vmem:[%s3017_s2 + $0x350] sm:$0xff]  ;;  %v1456_v3 = vld [vmem:[%s3017_s2 + $0x2e0] sm:$0xff]  ;;  %v913_v54 = vrot.slane %v2415_v12, 4  ;;  %v914_v55 = vrot.slane %v2435_v22, 4 }
  0x2f   : > { %1936 = vmatpush3.bf16.msra.mxu1 %v1935_v62  ;;  %869 = vmatprep.mubr.f32.mxu1 %v802_v19  ;;  %v1438_v62 = vld [vmem:[%s3017_s2 + $0x250] sm:$0xff]  ;;  %v1439_v63 = vld [vmem:[%s3017_s2 + $0x258] sm:$0xff]  ;;  %v1953_v1 = vpack.c.bf16 %v1487_v58, %v1486_v57  ;;  %v1457_v4 = vld [vmem:[%s3017_s2 + $0x2e8] sm:$0xff]  ;;  %v686_v56 = vsel %vm683_vm1, %v684_v39, %v685_v40  ;;  %v1026_v58 = vrot.slane %v2415_v12, 5 }
  0x30   : > { %1938 = vmatprep.subr.bf16.mxu1 %v1937_v8  ;;  %v1471_v2 = vld [vmem:[%s3017_s2 + $0x358] sm:$0xff]  ;;  %v1488_v6 = vld [vmem:[%s3017_s2 + $0x3e0] sm:$0xff]  ;;  %v1489_v7 = vld [vmem:[%s3017_s2 + $0x3e8] sm:$0xff]  ;;  %v1923_v8 = vpack.c.bf16 %v1439_v63, %v1438_v62  ;;  %v1925_v10 = vpack.c.bf16 %v1457_v4, %v1456_v3 }
  0x31   : > { %1908 = vmatpush3.bf16.msra.mxu0 %v1907_v18  ;;  %v1955_v9 = vpack.c.bf16 %v1471_v2, %v1470_v0  ;;  %v1440_v11 = vld [vmem:[%s3017_s2 + $0x260] sm:$0xff]  ;;  %v1441_v13 = vld [vmem:[%s3017_s2 + $0x268] sm:$0xff]  ;;  %v1957_v15 = vpack.c.bf16 %v1489_v7, %v1488_v6  ;;  %v1458_v18 = vld [vmem:[%s3017_s2 + $0x2f0] sm:$0xff]  ;;  %v915_v7 = vsel %vm909_vm5, %v913_v54, %v914_v55 }
  0x32   : > { %1910 = vmatprep.subr.bf16.mxu0 %v1909_v23  ;;  %v1472_v14 = vld [vmem:[%s3017_s2 + $0x360] sm:$0xff]  ;;  %v1473_v16 = vld [vmem:[%s3017_s2 + $0x368] sm:$0xff]  ;;  %v1459_v19 = vld [vmem:[%s3017_s2 + $0x2f8] sm:$0xff]  ;;  %v1927_v24 = vpack.c.bf16 %v1441_v13, %v1440_v11 }
  0x33   : > { %1940 = vmatpush3.bf16.msra.mxu1 %v1939_v21  ;;  %v1490_v21 = vld [vmem:[%s3017_s2 + $0x3f0] sm:$0xff]  ;;  %v1491_v23 = vld [vmem:[%s3017_s2 + $0x3f8] sm:$0xff]  ;;  %v1959_v25 = vpack.c.bf16 %v1473_v16, %v1472_v14  ;;  %v1929_v26 = vpack.c.bf16 %v1459_v19, %v1458_v18  ;;  %v1508_v33 = vld [vmem:[%s3017_s2 + $0x480] sm:$0xff] }
  0x34   : > { %1942 = vmatprep.subr.bf16.mxu1 %v1941_v27  ;;  %v1442_v27 = vld [vmem:[%s3017_s2 + $0x270] sm:$0xff]  ;;  %v1443_v28 = vld [vmem:[%s3017_s2 + $0x278] sm:$0xff]  ;;  %v1961_v30 = vpack.c.bf16 %v1491_v23, %v1490_v21  ;;  %v1492_v43 = vld [vmem:[%s3017_s2 + $0x400] sm:$0xff] }
  0x35   : > { %1912 = vmatpush3.bf16.msra.mxu0 %v1911_v35  ;;  %v1474_v29 = vld [vmem:[%s3017_s2 + $0x370] sm:$0xff]  ;;  %v1475_v31 = vld [vmem:[%s3017_s2 + $0x378] sm:$0xff]  ;;  %v1509_v35 = vld [vmem:[%s3017_s2 + $0x488] sm:$0xff]  ;;  %v1931_v38 = vpack.c.bf16 %v1443_v28, %v1442_v27 }
  0x36   : > { %1914 = vmatprep.subr.bf16.mxu0 %v1913_v37  ;;  %v1541_v37 = vld [vmem:[%s3017_s2 + $0x588] sm:$0xff]  ;;  %v1965_v42 = vpack.c.bf16 %v1509_v35, %v1508_v33  ;;  %v1510_v50 = vld [vmem:[%s3017_s2 + $0x490] sm:$0xff]  ;;  %v1511_v51 = vld [vmem:[%s3017_s2 + $0x498] sm:$0xff] }
  0x37   : > { %1944 = vmatpush3.bf16.msra.mxu1 %v1943_v36  ;;  %v1540_v36 = vld [vmem:[%s3017_s2 + $0x580] sm:$0xff]  ;;  %v1493_v44 = vld [vmem:[%s3017_s2 + $0x408] sm:$0xff]  ;;  %v1542_v52 = vld [vmem:[%s3017_s2 + $0x590] sm:$0xff]  ;;  %v1969_v62 = vpack.c.bf16 %v1511_v51, %v1510_v50 }
  0x38   : > { %1946 = vmatprep.subr.bf16.mxu1 %v1945_v41  ;;  %v1963_v41 = vpack.c.bf16 %v1475_v31, %v1474_v29  ;;  %v1967_v57 = vpack.c.bf16 %v1493_v44, %v1492_v43  ;;  %v1494_v63 = vld [vmem:[%s3017_s2 + $0x410] sm:$0xff]  ;;  %v1495_v0 = vld [vmem:[%s3017_s2 + $0x418] sm:$0xff]  ;;  %v1512_v2 = vld [vmem:[%s3017_s2 + $0x4a0] sm:$0xff] }
  0x39   : > { %1916 = vmatpush3.bf16.msra.mxu0 %v1915_v47  ;;  %v1524_v47 = vld [vmem:[%s3017_s2 + $0x500] sm:$0xff]  ;;  %v1526_v12 = vld [vmem:[%s3017_s2 + $0x510] sm:$0xff]  ;;  %v1513_v3 = vld [vmem:[%s3017_s2 + $0x4a8] sm:$0xff] }
  0x3a   : > { %1918 = vmatprep.subr.bf16.mxu0 %v1917_v49  ;;  %v1525_v49 = vld [vmem:[%s3017_s2 + $0x508] sm:$0xff]  ;;  %v1544_v4 = vld [vmem:[%s3017_s2 + $0x5a0] sm:$0xff]  ;;  %v1973_v11 = vpack.c.bf16 %v1513_v3, %v1512_v2  ;;  %v1514_v19 = vld [vmem:[%s3017_s2 + $0x4b0] sm:$0xff] }
  0x3b   : > { %1948 = vmatpush3.bf16.msra.mxu1 %v1947_v48  ;;  %v1997_v48 = vpack.c.bf16 %v1541_v37, %v1540_v36  ;;  %v1545_v6 = vld [vmem:[%s3017_s2 + $0x5a8] sm:$0xff]  ;;  %v1496_v13 = vld [vmem:[%s3017_s2 + $0x420] sm:$0xff]  ;;  %v1515_v21 = vld [vmem:[%s3017_s2 + $0x4b8] sm:$0xff] }
  0x3c   : > { %1950 = vmatprep.subr.bf16.mxu1 %v1949_v53  ;;  %v1543_v53 = vld [vmem:[%s3017_s2 + $0x598] sm:$0xff]  ;;  %v1497_v14 = vld [vmem:[%s3017_s2 + $0x428] sm:$0xff]  ;;  %v2005_v16 = vpack.c.bf16 %v1545_v6, %v1544_v4  ;;  %v1546_v23 = vld [vmem:[%s3017_s2 + $0x5b0] sm:$0xff]  ;;  %v1977_v27 = vpack.c.bf16 %v1515_v21, %v1514_v19 }
  0x3d   : > { %1920 = vmatpush3.bf16.msra.mxu0 %v1919_v59  ;;  %v1027_v59 = vrot.slane %v2435_v22, 5  ;;  %v2001_v22 = vpack.c.bf16 %v1543_v53, %v1542_v52  ;;  %v1529_v18 = vld [vmem:[%s3017_s2 + $0x528] sm:$0xff]  ;;  %v1498_v28 = vld [vmem:[%s3017_s2 + $0x430] sm:$0xff]  ;;  %v1499_v29 = vld [vmem:[%s3017_s2 + $0x438] sm:$0xff] }
  0x3e   : > { %1922 = vmatprep.subr.bf16.mxu0 %v1921_v61  ;;  %v1999_v61 = vpack.c.bf16 %v1525_v49, %v1524_v47  ;;  %v1531_v33 = vld [vmem:[%s3017_s2 + $0x538] sm:$0xff]  ;;  %v1516_v35 = vld [vmem:[%s3017_s2 + $0x4c0] sm:$0xff]  ;;  %v1517_v36 = vld [vmem:[%s3017_s2 + $0x4c8] sm:$0xff]  ;;  %v1979_v39 = vpack.c.bf16 %v1499_v29, %v1498_v28 }
  0x3f   : > { %1952 = vmatpush3.bf16.msra.mxu1 %v1951_v60  ;;  %v799_v60 = vsel %vm796_vm2, %v797_v45, %v798_v46  ;;  %v1548_v37 = vld [vmem:[%s3017_s2 + $0x5c0] sm:$0xff]  ;;  %v1501_v43 = vld [vmem:[%s3017_s2 + $0x448] sm:$0xff]  ;;  %v1518_v47 = vld [vmem:[%s3017_s2 + $0x4d0] sm:$0xff] }
  0x40   : > { %1954 = vmatprep.subr.bf16.mxu1 %v1953_v1  ;;  %v1527_v1 = vld [vmem:[%s3017_s2 + $0x518] sm:$0xff]  ;;  %v1532_v44 = vld [vmem:[%s3017_s2 + $0x540] sm:$0xff]  ;;  %v1533_v46 = vld [vmem:[%s3017_s2 + $0x548] sm:$0xff] }
  0x41   : > { %1924 = vmatpush3.bf16.msra.mxu0 %v1923_v8  ;;  %v1971_v8 = vpack.c.bf16 %v1495_v0, %v1494_v63  ;;  %v1550_v49 = vld [vmem:[%s3017_s2 + $0x5d0] sm:$0xff]  ;;  %v1551_v50 = vld [vmem:[%s3017_s2 + $0x5d8] sm:$0xff]  ;;  %v2015_v52 = vpack.c.bf16 %v1533_v46, %v1532_v44  ;;  %v1536_v2 = vld [vmem:[%s3017_s2 + $0x560] sm:$0xff] }
  0x42   : > { %1926 = vmatprep.subr.bf16.mxu0 %v1925_v10  ;;  %v2003_v10 = vpack.c.bf16 %v1527_v1, %v1526_v12  ;;  %v1502_v54 = vld [vmem:[%s3017_s2 + $0x450] sm:$0xff]  ;;  %v1503_v55 = vld [vmem:[%s3017_s2 + $0x458] sm:$0xff]  ;;  %v1505_v1 = vld [vmem:[%s3017_s2 + $0x468] sm:$0xff] }
  0x43   : > { %1956 = vmatpush3.bf16.msra.mxu1 %v1955_v9  ;;  %v1028_v9 = vsel %vm1022_vm3, %v1026_v58, %v1027_v59  ;;  %v1535_v58 = vld [vmem:[%s3017_s2 + $0x558] sm:$0xff]  ;;  %v1520_v59 = vld [vmem:[%s3017_s2 + $0x4e0] sm:$0xff]  ;;  %v1987_v63 = vpack.c.bf16 %v1503_v55, %v1502_v54  ;;  %v1537_v4 = vld [vmem:[%s3017_s2 + $0x568] sm:$0xff] }
  0x44   : > { %1958 = vmatprep.subr.bf16.mxu1 %v1957_v15  ;;  %v1528_v15 = vld [vmem:[%s3017_s2 + $0x520] sm:$0xff]  ;;  %v1522_v6 = vld [vmem:[%s3017_s2 + $0x4f0] sm:$0xff]  ;;  %v1539_v19 = vld [vmem:[%s3017_s2 + $0x578] sm:$0xff] }
  0x45   : > { %1928 = vmatpush3.bf16.msra.mxu0 %v1927_v24  ;;  %v1547_v24 = vld [vmem:[%s3017_s2 + $0x5b8] sm:$0xff]  ;;  %v1572_v21 = vld [vmem:[%s3017_s2 + $0x680] sm:$0xff]  ;;  %v1578_v44 = vld [vmem:[%s3017_s2 + $0x6b0] sm:$0xff] }
  0x46   : > { %1930 = vmatprep.subr.bf16.mxu0 %v1929_v26  ;;  %v2007_v26 = vpack.c.bf16 %v1529_v18, %v1528_v15  ;;  %v2009_v31 = vpack.c.bf16 %v1547_v24, %v1546_v23  ;;  %v1507_v15 = vld [vmem:[%s3017_s2 + $0x478] sm:$0xff]  ;;  %v1573_v23 = vld [vmem:[%s3017_s2 + $0x688] sm:$0xff]  ;;  %v1556_v29 = vld [vmem:[%s3017_s2 + $0x600] sm:$0xff] }
  0x47   : > { %1960 = vmatpush3.bf16.msra.mxu1 %v1959_v25  ;;  %v1975_v25 = vpack.c.bf16 %v1497_v14, %v1496_v13  ;;  %v1506_v14 = vld [vmem:[%s3017_s2 + $0x470] sm:$0xff]  ;;  %v2029_v28 = vpack.c.bf16 %v1573_v23, %v1572_v21  ;;  %v1583_v55 = vld [vmem:[%s3017_s2 + $0x6d8] sm:$0xff] }
  0x48   : > { %1962 = vmatprep.subr.bf16.mxu1 %v1961_v30  ;;  %v1530_v30 = vld [vmem:[%s3017_s2 + $0x530] sm:$0xff]  ;;  %v1995_v24 = vpack.c.bf16 %v1507_v15, %v1506_v14 }
  0x49   : > { %1932 = vmatpush3.bf16.msra.mxu0 %v1931_v38  ;;  %v1549_v38 = vld [vmem:[%s3017_s2 + $0x5c8] sm:$0xff]  ;;  %v2011_v40 = vpack.c.bf16 %v1531_v33, %v1530_v30  ;;  %v1582_v54 = vld [vmem:[%s3017_s2 + $0x6d0] sm:$0xff] }
  0x4a   : > { %1966 = vmatprep.subr.bf16.mxu0 %v1965_v42  ;;  %v1500_v42 = vld [vmem:[%s3017_s2 + $0x440] sm:$0xff]  ;;  %v2013_v45 = vpack.c.bf16 %v1549_v38, %v1548_v37  ;;  %v1557_v30 = vld [vmem:[%s3017_s2 + $0x608] sm:$0xff]  ;;  %v1559_v37 = vld [vmem:[%s3017_s2 + $0x618] sm:$0xff] }
  0x4b   : > { %1964 = vmatpush3.bf16.msra.mxu1 %v1963_v41  ;;  %v1981_v41 = vpack.c.bf16 %v1517_v36, %v1516_v35  ;;  %v1983_v51 = vpack.c.bf16 %v1501_v43, %v1500_v42  ;;  %v2031_v33 = vpack.c.bf16 %v1557_v30, %v1556_v29  ;;  %v1558_v36 = vld [vmem:[%s3017_s2 + $0x610] sm:$0xff]  ;;  %v1576_v38 = vld [vmem:[%s3017_s2 + $0x6a0] sm:$0xff]  ;;  %v1561_v43 = vld [vmem:[%s3017_s2 + $0x628] sm:$0xff] }
  0x4c   : > { %1998 = vmatprep.subr.bf16.mxu1 %v1997_v48  ;;  %757 = vmatmul.mubr.f32.vlgmr.msra.gmra.mrb[2].mxu0 %v686_v56  ;;  %v1519_v48 = vld [vmem:[%s3017_s2 + $0x4d8] sm:$0xff]  ;;  %v1534_v56 = vld [vmem:[%s3017_s2 + $0x550] sm:$0xff]  ;;  %v1560_v42 = vld [vmem:[%s3017_s2 + $0x620] sm:$0xff] }
  0x4d   : > { %1968 = vmatpush3.bf16.msra.mxu0 %v1967_v57  ;;  %982 = vmatprep.mubr.f32.mxu0 %v915_v7  ;;  %v1985_v53 = vpack.c.bf16 %v1519_v48, %v1518_v47  ;;  %v2017_v57 = vpack.c.bf16 %v1551_v50, %v1550_v49  ;;  %v2019_v0 = vpack.c.bf16 %v1535_v58, %v1534_v56  ;;  %v1523_v7 = vld [vmem:[%s3017_s2 + $0x4f8] sm:$0xff]  ;;  %v1562_v47 = vld [vmem:[%s3017_s2 + $0x630] sm:$0xff]  ;;  %v1580_v48 = vld [vmem:[%s3017_s2 + $0x6c0] sm:$0xff] }
  0x4e   : > { %870 = vmatmul.mubr.f32.vlgmr.msra.gmra.mrb[2].mxu1 %v799_v60  ;;  %1970 = vmatprep.subr.bf16.mxu0 %v1969_v62  ;;  %v1521_v60 = vld [vmem:[%s3017_s2 + $0x4e8] sm:$0xff]  ;;  %v1993_v13 = vpack.c.bf16 %v1523_v7, %v1522_v6  ;;  %v1566_v58 = vld [vmem:[%s3017_s2 + $0x650] sm:$0xff]  ;;  %v1571_v6 = vld [vmem:[%s3017_s2 + $0x678] sm:$0xff] }
  0x4f   : > { %2000 = vmatpush3.bf16.msra.mxu1 %v1999_v61  ;;  %1095 = vmatprep.mubr.f32.mxu1 %v1028_v9  ;;  %v1552_v61 = vld [vmem:[%s3017_s2 + $0x5e0] sm:$0xff]  ;;  %v1553_v62 = vld [vmem:[%s3017_s2 + $0x5e8] sm:$0xff]  ;;  %v1989_v12 = vpack.c.bf16 %v1521_v60, %v1520_v59  ;;  %v1555_v9 = vld [vmem:[%s3017_s2 + $0x5f8] sm:$0xff] }
  0x50   : > { %2002 = vmatprep.subr.bf16.mxu1 %v2001_v22  ;;  %v1504_v22 = vld [vmem:[%s3017_s2 + $0x460] sm:$0xff]  ;;  %v2021_v3 = vpack.c.bf16 %v1553_v62, %v1552_v61  ;;  %v1581_v49 = vld [vmem:[%s3017_s2 + $0x6c8] sm:$0xff]  ;;  %v1567_v59 = vld [vmem:[%s3017_s2 + $0x658] sm:$0xff] }
  0x51   : > { %1972 = vmatpush3.bf16.msra.mxu0 %v1971_v8  ;;  %v1554_v8 = vld [vmem:[%s3017_s2 + $0x5f0] sm:$0xff]  ;;  %v1584_v60 = vld [vmem:[%s3017_s2 + $0x6e0] sm:$0xff]  ;;  %v1585_v61 = vld [vmem:[%s3017_s2 + $0x6e8] sm:$0xff]  ;;  %v2051_v62 = vpack.c.bf16 %v1567_v59, %v1566_v58 }
  0x52   : > { %1974 = vmatprep.subr.bf16.mxu0 %v1973_v11  ;;  %v2023_v11 = vpack.c.bf16 %v1537_v4, %v1536_v2  ;;  %v2025_v18 = vpack.c.bf16 %v1555_v9, %v1554_v8  ;;  %v1570_v4 = vld [vmem:[%s3017_s2 + $0x670] sm:$0xff]  ;;  %v1395_v9 = vld [vmem:[%s3018_s3] ss:$0 sm:$0xff] }
  0x53   : > { %2004 = vmatpush3.bf16.msra.mxu1 %v2003_v10  ;;  %v1991_v10 = vpack.c.bf16 %v1505_v1, %v1504_v22  ;;  %v1586_v22 = vld [vmem:[%s3017_s2 + $0x6f0] sm:$0xff]  ;;  %v1587_v1 = vld [vmem:[%s3017_s2 + $0x6f8] sm:$0xff]  ;;  %v2059_v7 = vpack.c.bf16 %v1571_v6, %v1570_v4 }
  0x54   : > { %2006 = vmatprep.subr.bf16.mxu1 %v2005_v16  ;;  %v1538_v16 = vld [vmem:[%s3017_s2 + $0x570] sm:$0xff] }
  0x55   : > { %1976 = vmatpush3.bf16.msra.mxu0 %v1975_v25  ;;  %v910_v25 = vrot.slane %v2454_v32, 4  ;;  %v1575_v32 = vld [vmem:[%s3017_s2 + $0x698] sm:$0xff] }
  0x56   : > { %1978 = vmatprep.subr.bf16.mxu0 %v1977_v27  ;;  %v2027_v27 = vpack.c.bf16 %v1539_v19, %v1538_v16 }
  0x57   : > { %2008 = vmatpush3.bf16.msra.mxu1 %v2007_v26  ;;  %v911_v26 = vrot.slane %v2458_v34, 4 }
  0x58   : > { %2010 = vmatprep.subr.bf16.mxu1 %v2009_v31  ;;  %v1574_v31 = vld [vmem:[%s3017_s2 + $0x690] sm:$0xff] }
  0x59   : > { %1980 = vmatpush3.bf16.msra.mxu0 %v1979_v39  ;;  %v912_v34 = vsel %vm909_vm5, %v910_v25, %v911_v26  ;;  %v2033_v35 = vpack.c.bf16 %v1575_v32, %v1574_v31  ;;  %v1577_v39 = vld [vmem:[%s3017_s2 + $0x6a8] sm:$0xff] }
  0x5a   : > { %1982 = vmatprep.subr.bf16.mxu0 %v1981_v41  ;;  %v2037_v41 = vpack.c.bf16 %v1577_v39, %v1576_v38 }
  0x5b   : > { %2012 = vmatpush3.bf16.msra.mxu1 %v2011_v40  ;;  %v2035_v40 = vpack.c.bf16 %v1559_v37, %v1558_v36 }
  0x5c   : > { %2014 = vmatprep.subr.bf16.mxu1 %v2013_v45  ;;  %v2039_v45 = vpack.c.bf16 %v1561_v43, %v1560_v42 }
  0x5d   : > { %1984 = vmatpush3.bf16.msra.mxu0 %v1983_v51  ;;  %v2045_v51 = vpack.c.bf16 %v1581_v49, %v1580_v48 }
  0x5e   : > { %1986 = vmatprep.subr.bf16.mxu0 %v1985_v53  ;;  %v1565_v53 = vld [vmem:[%s3017_s2 + $0x648] sm:$0xff] }
  0x5f   : > { %2016 = vmatpush3.bf16.msra.mxu1 %v2015_v52  ;;  %v1564_v52 = vld [vmem:[%s3017_s2 + $0x640] sm:$0xff] }
  0x60   : > { %2018 = vmatprep.subr.bf16.mxu1 %v2017_v57  ;;  %v2047_v56 = vpack.c.bf16 %v1565_v53, %v1564_v52  ;;  %v2049_v57 = vpack.c.bf16 %v1583_v55, %v1582_v54 }
  0x61   : > { %1988 = vmatpush3.bf16.msra.mxu0 %v1987_v63  ;;  %v2053_v63 = vpack.c.bf16 %v1585_v61, %v1584_v60 }
  0x62   : > { %1990 = vmatprep.subr.bf16.mxu0 %v1989_v12  ;;  %v1569_v12 = vld [vmem:[%s3017_s2 + $0x668] sm:$0xff] }
  0x63   : > { %2020 = vmatpush3.bf16.msra.mxu1 %v2019_v0  ;;  %v1568_v0 = vld [vmem:[%s3017_s2 + $0x660] sm:$0xff] }
  0x64   : > { %2022 = vmatprep.subr.bf16.mxu1 %v2021_v3  ;;  %v2055_v2 = vpack.c.bf16 %v1569_v12, %v1568_v0  ;;  %v2057_v3 = vpack.c.bf16 %v1587_v1, %v1586_v22 }
  0x65   : > { %1992 = vmatpush3.bf16.msra.mxu0 %v1991_v10 }
  0x66   : > { %1994 = vmatprep.subr.bf16.mxu0 %v1993_v13 }
  0x67   : > { %2024 = vmatpush3.bf16.msra.mxu1 %v2023_v11 }
  0x68   : > { %2026 = vmatprep.subr.bf16.mxu1 %v2025_v18 }
  0x69   : > { %1996 = vmatpush3.bf16.msra.mxu0 %v1995_v24 }
  0x6a   : > { %2030 = vmatprep.subr.bf16.mxu0 %v2029_v28 }
  0x6b   : > { %2028 = vmatpush3.bf16.msra.mxu1 %v2027_v27 }
  0x6c   : > { %983 = vmatmul.mubr.f32.vlgmr.msra.gmra.mrb[4].mxu0 %v912_v34 }
  0x6d   : > { %2032 = vmatpush3.bf16.msra.mxu0 %v2031_v33  ;;  %1208 = vmatprep.mubr.f32.mxu0 %v2542_v17  ;;  %v1563_v17 = vld [vmem:[%s3017_s2 + $0x638] sm:$0xff] }
  0x6e   : > { %1096 = vmatmul.mubr.f32.vlgmr.msra.gmra.mrb[4].mxu1 %v2519_v5  ;;  %2034 = vmatprep.subr.bf16.mxu0 %v2033_v35  ;;  %v1579_v5 = vld [vmem:[%s3017_s2 + $0x6b8] sm:$0xff]  ;;  %v2043_v50 = vpack.c.bf16 %v1563_v17, %v1562_v47 }
  0x6f   : > { %v2041_v46 = vpack.c.bf16 %v1579_v5, %v1578_v44 }
  0x71   : > { %2036 = vmatpush3.bf16.msra.mxu0 %v2035_v40 }
  0x72   : > { %2038 = vmatprep.subr.bf16.mxu0 %v2037_v41 }
  0x75   : > { %2040 = vmatpush3.bf16.msra.mxu0 %v2039_v45 }
  0x76   : > { %2042 = vmatprep.subr.bf16.mxu0 %v2041_v46 }
  0x79   : > { %2044 = vmatpush3.bf16.msra.mxu0 %v2043_v50 }
  0x7a   : > { %2046 = vmatprep.subr.bf16.mxu0 %v2045_v51 }
  0x7d   : > { %2048 = vmatpush3.bf16.msra.mxu0 %v2047_v56 }
  0x7e   : > { %2050 = vmatprep.subr.bf16.mxu0 %v2049_v57 }
  0x81   : > { %2052 = vmatpush3.bf16.msra.mxu0 %v2051_v62 }
  0x82   : > { %2054 = vmatprep.subr.bf16.mxu0 %v2053_v63 }
  0x85   : > { %2056 = vmatpush3.bf16.msra.mxu0 %v2055_v2 }
  0x86   : > { %2058 = vmatprep.subr.bf16.mxu0 %v2057_v3 }
  0x89   : > { %2060 = vmatpush3.bf16.msra.mxu0 %v2059_v7 }
  0x8c   : > { %1209 = vmatmul.mubr.f32.vlgmr.msra.gmra.mrb[6].mxu0 %v2546_v20 }
  0xff   : > { %v1624_v8 = vpop.f32.mrb[0].mxu0 }
 0x100   : > { %v1625_v10 = vpop.f32.mrb[1].mxu0 }
 0x101   : > { %v1659_v11 = vpop.f32.mrb[0].mxu1  ;;  %v1626_v13 = vadd.f32 %v1625_v10, %v1624_v8 }
 0x102   : > { %v1660_v14 = vpop.f32.mrb[1].mxu1 }
 0x103   : > { %v1661_v15 = vadd.f32 %v1660_v14, %v1659_v11  ;;  %v532_v16 = vadd.f32 %v1626_v13, %v1395_v9 }
 0x105   : > { %v649_v18 = vadd.f32 %v1661_v15, %v532_v16 }
 0x11f   : > { %v1694_v19 = vpop.f32.mrb[2].mxu0 }
 0x120   : > { %v1695_v21 = vpop.f32.mrb[3].mxu0 }
 0x121   : > { %v1729_v23 = vpop.f32.mrb[2].mxu1  ;;  %v1696_v24 = vadd.f32 %v1695_v21, %v1694_v19 }
 0x122   : > { %v1730_v25 = vpop.f32.mrb[3].mxu1 }
 0x123   : > { %v1731_v20 = vadd.f32 %v1730_v25, %v1729_v23  ;;  %v762_v26 = vadd.f32 %v1696_v24, %v649_v18 }
 0x125   : > { %v875_v27 = vadd.f32 %v1731_v20, %v762_v26 }
 0x13f   : > { %v1764_v28 = vpop.f32.mrb[4].mxu0 }
 0x140   : > { %v1765_v29 = vpop.f32.mrb[5].mxu0 }
 0x141   : > { %v1799_v30 = vpop.f32.mrb[4].mxu1  ;;  %v1766_v31 = vadd.f32 %v1765_v29, %v1764_v28 }
 0x142   : > { %v1800_v32 = vpop.f32.mrb[5].mxu1 }
 0x143   : > { %v1801_v34 = vadd.f32 %v1800_v32, %v1799_v30  ;;  %v988_v33 = vadd.f32 %v1766_v31, %v875_v27 }
 0x145   : > { %v1101_v35 = vadd.f32 %v1801_v34, %v988_v33 }
 0x15f   : > { %v1834_v36 = vpop.f32.mrb[6].mxu0 }
 0x160   : > { %v1835_v37 = vpop.f32.mrb[7].mxu0 }
 0x161   : > { %v1836_v38 = vadd.f32 %v1835_v37, %v1834_v36 }
 0x163   : > { %v1214_v39 = vadd.f32 %v1836_v38, %v1101_v35 }
 0x165   : > { %1215 = vst [vmem:[%s401_s18] sm:$0xff] %v1214_v39  ;;  %v1216_v40 = vrot.slane %v1214_v39, 4  ;;  %v1223_v41 = vmul.f32 %v1214_v39, %v1214_v39 }
 0x167   : > { %v1217_v42 = vadd.f32 %v1216_v40, %v1214_v39  ;;  %v1224_v43 = vrot.slane %v1223_v41, 4 }
 0x169   : > { %v1218_v44 = vrot.slane %v1217_v42, 2  ;;  %v1225_v5 = vadd.f32 %v1224_v43, %v1223_v41 }
 0x16b   : > { %v1219_v45 = vadd.f32 %v1218_v44, %v1217_v42  ;;  %v1226_v46 = vrot.slane %v1225_v5, 2 }
 0x16d   : > { %v1220_v47 = vrot.slane %v1219_v45, 1  ;;  %v1227_v17 = vadd.f32 %v1226_v46, %v1225_v5 }
 0x16f   : > { %v1221_v48 = vadd.f32 %v1220_v47, %v1219_v45  ;;  %v1228_v49 = vrot.slane %v1227_v17, 1 }
 0x171   : > { %1222 = vst [vmem:[%s408_s13] sm:$0x1] %v1221_v48  ;;  %v1229_v50 = vadd.f32 %v1228_v49, %v1227_v17 }
 0x173   : > { %1230 = vst [vmem:[%s415_s17] sm:$0x1] %v1229_v50 }
 0x174 PF: > { %s19_s4 = sadd.s32 1, %s2139_s4   ;;  %s3024_s27 = smov %s2131_s29 }
 0x175   : > { %p16_p8 = scmp.ge.s32.totalorder %s19_s4, 6   ;;  %s3025_s28 = smov %s2135_s30 }
 0x176   : > { %s3026_s29 = smov %s3029_s5  ;;  %s3027_s30 = smov %s3033_s9 }
 0x177   :  { %18 = sbr.rel (!%p16_p8) target bundleno = 3 (0x3), region = 107 }

// kernel: tile.59
= control target key start
LH: loop header
LB: loop body
LE: loop exit
PB: predicated region body
PF: predicated region fallthrough
CT: control target
= control target key end

     0   :  { %s64_s0 = inlined_call_operand.vmem [shape: f32[2], index: 0, kind: input, shape index: {}]   ;;  %s65_s1 = inlined_call_operand.vmem [shape: f32[64,2], index: 1, kind: output, shape index: {}]  }
   0x1   :  { %v4_v0 = vld [vmem:[%s64_s0] ss:$0 sm:$0xff] }
   0x2   :  { %5 = vst [vmem:[%s65_s1] sm:$0xff] %v4_v0  ;;  %20 = vst [vmem:[%s65_s1 + $0x8] sm:$0xff] %v4_v0 }
   0x3   :  { %21 = vst [vmem:[%s65_s1 + $0x10] sm:$0xff] %v4_v0  ;;  %22 = vst [vmem:[%s65_s1 + $0x18] sm:$0xff] %v4_v0 }
   0x4   :  { %23 = vst [vmem:[%s65_s1 + $0x20] sm:$0xff] %v4_v0  ;;  %24 = vst [vmem:[%s65_s1 + $0x28] sm:$0xff] %v4_v0 }
   0x5   :  { %25 = vst [vmem:[%s65_s1 + $0x30] sm:$0xff] %v4_v0  ;;  %26 = vst [vmem:[%s65_s1 + $0x38] sm:$0xff] %v4_v0 }

// kernel: tile.54
= control target key start
LH: loop header
LB: loop body
LE: loop exit
PB: predicated region body
PF: predicated region fallthrough
CT: control target
= control target key end

     0   :  { %s28_s0 = inlined_call_operand.vmem [shape: f32[8], index: 0, kind: input, shape index: {}]   ;;  %s29_s1 = inlined_call_operand.vmem [shape: f32[16,8], index: 1, kind: output, shape index: {}]  }
   0x1   :  { %v4_v0 = vld [vmem:[%s28_s0] ss:$0 sm:$0xff] }
   0x2   :  { %5 = vst [vmem:[%s29_s1] sm:$0xff] %v4_v0  ;;  %8 = vst [vmem:[%s29_s1 + $0x8] sm:$0xff] %v4_v0 }

// kernel: _lambda_.6
= control target key start
LH: loop header
LB: loop body
LE: loop exit
PB: predicated region body
PF: predicated region fallthrough
CT: control target
= control target key end

     0   :  { %s2064_s27 = smov 0   ;;  %s2066_s28 = smov 0   ;;  %s2582_s0 = inlined_call_operand.vmem [shape: f32[48,128], index: 0, kind: input, shape index: {}, may-alias: {0,1}]   ;;  %s2583_s1 = inlined_call_operand.vmem [shape: f32[48,128], index: 1, kind: input, shape index: {}, may-alias: {0,1}]   ;;  %s2584_s2 = inlined_call_operand.vmem [shape: f32[7,128,128], index: 2, kind: input, shape index: {}]   ;;  %s2585_s3 = inlined_call_operand.vmem [shape: f32[1,128], index: 3, kind: input, shape index: {}]   ;;  %s2586_s4 = inlined_call_operand.vmem [shape: f32[1,128], index: 4, kind: input, shape index: {}]   ;;  %s2587_s5 = inlined_call_operand.vmem [shape: f32[1,128], index: 5, kind: input, shape index: {}]   ;;  %s2588_s6 = inlined_call_operand.vmem [shape: f32[32,128], index: 6, kind: output, shape index: {0}]   ;;  %s2589_s7 = inlined_call_operand.vmem [shape: f32[4,1,128], index: 7, kind: output, shape index: {1}]   ;;  %s2590_s8 = inlined_call_operand.vmem [shape: f32[4,1,128], index: 8, kind: output, shape index: {2}]  }
   0x1   :  { %s2068_s29 = smov 0   ;;  %s2070_s30 = smov 0  }
   0x2   :  { %s2072_s9 = smov 0  }
   0x3 LB: > { %s28_s10 = sadd.s32 1, %s2006_s29  ;;  %s31_s11 = sadd.s32 1, %s2010_s30  ;;  %s2014_s9 = sphi %s2072_s9, %s19_s9   ;;  %s2010_s30 = sphi %s2070_s30, %s2596_s30   ;;  %s2006_s29 = sphi %s2068_s29, %s2595_s29   ;;  %s2002_s28 = sphi %s2066_s28, %s2594_s28   ;;  %s1998_s27 = sphi %s2064_s27, %s2593_s27  }
   0x4   : > { %p29_p0 = scmp.ge.s32.totalorder %s28_s10, 2  ;;  %p1279_p1 = scmp.ge.s32.totalorder %s2014_s9, 1 }
   0x5   : > { %p319_p2 = scmp.lt.s32.totalorder %s2014_s9, 5 }
   0x6   : > { %s2598_s10 = smov (%p29_p0, %s28_s10), 0  ;;  %s2600_s11 = smov (!%p29_p0, %s31_s11), %s2010_s30 }
   0x7   : > { %p320_p3 = pnand %p1279_p1, %p319_p2  ;;  %p33_p4 = scmp.ge.s32.totalorder %s2600_s11, 2 }
   0x8   : > { %v461_v0 = vld [vmem:[%s2584_s2] sm:$0xff] (!%p320_p3)  ;;  %v462_v1 = vld [vmem:[%s2584_s2 + $0x8] sm:$0xff] (!%p320_p3)  ;;  %v415_v3 = vlaneseq (!%p320_p3)  ;;  %v2016_v4 = vmov (!%p320_p3), 0.0|0.0   ;;  %v463_v7 = vld [vmem:[%s2584_s2 + $0x10] sm:$0xff] (!%p320_p3)  ;;  %s372_s24 = smul.u32 (!%p320_p3), 3, %s2002_s28  ;;  %s381_s25 = sadd.s32 (!%p320_p3), 1, %s1998_s27 }
   0x9   : > { %s2602_s11 = smov (%p33_p4, %s2600_s11), 0  ;;  %323 = sbr.rel (%p320_p3) target bundleno = 369 (0x171), region = 44 }
   0xa   : > { %v1323_v2 = vld [vmem:[%s2584_s2 + $0x180] sm:$0xff] (!%p320_p3)  ;;  %1753 = vmatprep.subr.bf16.mxu1 (!%p320_p3), %v2016_v4  ;;  %1825 = vmatprep.subr.bf16.mxu0 (!%p320_p3), %v2016_v4  ;;  %v1754_v5 = vpack.c.bf16 (!%p320_p3), %v462_v1, %v461_v0  ;;  %v1324_v6 = vld [vmem:[%s2584_s2 + $0x188] sm:$0xff] (!%p320_p3)  ;;  %v464_v8 = vld [vmem:[%s2584_s2 + $0x18] sm:$0xff] (!%p320_p3)  ;;  %vm2017_vm0 = vmmov (!%p320_p3), 0   ;;  %v2018_v12 = vmov (!%p320_p3), 0.0   ;;  %s373_s15 = sadd.s32 (!%p320_p3), %s1998_s27, %s372_s24  ;;  %s382_s16 = sadd.s32 (!%p320_p3), %s381_s25, %s372_s24  ;;  %v416_v17 = vshrl.u32 (!%p320_p3), %v415_v3, 7 }
   0xb   : > { %v1826_v9 = vpack.c.bf16 (!%p320_p3), %v1324_v6, %v1323_v2  ;;  %v1325_v10 = vld [vmem:[%s2584_s2 + $0x190] sm:$0xff] (!%p320_p3)  ;;  %v1326_v11 = vld [vmem:[%s2584_s2 + $0x198] sm:$0xff] (!%p320_p3)  ;;  %1540 = vmatprep.mubr.msk.f32.mxu1 (!%p320_p3), %vm2017_vm0, %v2018_v12  ;;  %1645 = vmatprep.mubr.msk.f32.mxu0 (!%p320_p3), %vm2017_vm0, %v2018_v12  ;;  %v1757_v13 = vpack.c.bf16 (!%p320_p3), %v464_v8, %v463_v7  ;;  %v465_v15 = vld [vmem:[%s2584_s2 + $0x20] sm:$0xff] (!%p320_p3)  ;;  %p374_p5 = scmp.lt.s32.totalorder (!%p320_p3), %s373_s15, 5  ;;  %p383_p6 = scmp.lt.s32.totalorder (!%p320_p3), %s382_s16, 5  ;;  %vm939_vm7 = vcmask (!%p320_p3), 1042432  }
   0xc   : > { %1755 = vmatpush3.bf16.msra.mxu1 (!%p320_p3), %v1754_v5  ;;  %v1829_v14 = vpack.c.bf16 (!%p320_p3), %v1326_v11, %v1325_v10  ;;  %v466_v16 = vld [vmem:[%s2584_s2 + $0x28] sm:$0xff] (!%p320_p3)  ;;  %v1327_v18 = vld [vmem:[%s2584_s2 + $0x1a0] sm:$0xff] (!%p320_p3)  ;;  %s1286_s25 = sshll.u32 (!%p320_p3), %s1998_s27, 3  ;;  %v467_v21 = vld [vmem:[%s2584_s2 + $0x30] sm:$0xff] (!%p320_p3)  ;;  %v417_v26 = vadd.s32 (!%p320_p3), 8, %v416_v17  ;;  %vm1032_vm8 = vcmask (!%p320_p3), 1041408  }
   0xd   : > { %1827 = vmatpush3.bf16.msra.mxu0 (!%p320_p3), %v1826_v9  ;;  %1756 = vmatprep.subr.bf16.mxu1 (!%p320_p3), %v2016_v4  ;;  %v1328_v19 = vld [vmem:[%s2584_s2 + $0x1a8] sm:$0xff] (!%p320_p3)  ;;  %v1760_v20 = vpack.c.bf16 (!%p320_p3), %v466_v16, %v465_v15  ;;  %v468_v23 = vld [vmem:[%s2584_s2 + $0x38] sm:$0xff] (!%p320_p3)  ;;  %v1329_v24 = vld [vmem:[%s2584_s2 + $0x1b0] sm:$0xff] (!%p320_p3)  ;;  %v418_v27 = vstv (!%p320_p3), %s1286_s25  ;;  %vm753_vm9 = vcmask (!%p320_p3), 1044480   ;;  %vm567_vm10 = vcmask (!%p320_p3), 1046528   ;;  %s1282_s17 = sshll.u32 (!%p320_p3), %s2002_s28, 1 }
   0xe   : > { %1828 = vmatprep.subr.bf16.mxu0 (!%p320_p3), %v2016_v4  ;;  %v1832_v22 = vpack.c.bf16 (!%p320_p3), %v1328_v19, %v1327_v18  ;;  %v1330_v25 = vld [vmem:[%s2584_s2 + $0x1b8] sm:$0xff] (!%p320_p3)  ;;  %v1763_v29 = vpack.c.bf16 (!%p320_p3), %v468_v23, %v467_v21  ;;  %v419_v32 = vadd.s32 (!%p320_p3), %v418_v27, %v416_v17  ;;  %v1287_v33 = vld [vmem:[%s2586_s4] ss:$0 sm:$0xff] (!%p320_p3)  ;;  %v470_v35 = vld [vmem:[%s2584_s2 + $0x48] sm:$0xff] (!%p320_p3)  ;;  %v420_v36 = vadd.s32 (!%p320_p3), %v418_v27, %v417_v26  ;;  %s391_s25 = sadd.s32 (!%p320_p3), %s1998_s27, %s1282_s17 }
   0xf   : > { %v1835_v30 = vpack.c.bf16 (!%p320_p3), %v1330_v25, %v1329_v24  ;;  %v469_v34 = vld [vmem:[%s2584_s2 + $0x40] sm:$0xff] (!%p320_p3)  ;;  %v1332_v41 = vld [vmem:[%s2584_s2 + $0x1c8] sm:$0xff] (!%p320_p3)  ;;  %v471_v46 = vld [vmem:[%s2584_s2 + $0x50] sm:$0xff] (!%p320_p3)  ;;  %vm846_vm11 = vcmask (!%p320_p3), 1043456   ;;  %vm660_vm12 = vcmask (!%p320_p3), 1045504   ;;  %p392_p7 = scmp.lt.s32.totalorder (!%p320_p3), %s391_s25, 3 }
  0x10   : > { %s2604_s15 = smov (!%p374_p5, %s373_s15), 5  ;;  %1758 = vmatpush3.bf16.msra.mxu1 %v1757_v13  ;;  %s2606_s16 = smov (!%p383_p6, %s382_s16), 5  ;;  %v1288_v39 = vld [vmem:[%s2587_s5] ss:$0 sm:$0xff]  ;;  %v1766_v44 = vpack.c.bf16 %v470_v35, %v469_v34  ;;  %vm421_vm1 = vcmp.ge.s32.totalorder %v419_v32, 3  ;;  %vm423_vm2 = vcmp.lt.s32.totalorder %v419_v32, 19 }
  0x11   : > { %1830 = vmatpush3.bf16.msra.mxu0 %v1829_v14  ;;  %1759 = vmatprep.subr.bf16.mxu1 %v2016_v4  ;;  %s1280_s21 = sshll.u32 %s2604_s15, 3  ;;  %s1281_s26 = sshll.u32 %s2606_s16, 3  ;;  %v1331_v40 = vld [vmem:[%s2584_s2 + $0x1c0] sm:$0xff]  ;;  %v472_v47 = vld [vmem:[%s2584_s2 + $0x58] sm:$0xff]  ;;  %vm422_vm3 = vcmp.ge.s32.totalorder %v420_v36, 3  ;;  %vm424_vm4 = vcmp.lt.s32.totalorder %v420_v36, 19  ;;  %vm2202_vm5 = vmand %vm421_vm1, %vm423_vm2 }
  0x12   : > { %1831 = vmatprep.subr.bf16.mxu0 %v2016_v4  ;;  %s377_s24 = scalar_lea.vmem %s2582_s0, %s1280_s21  ;;  %s386_s14 = scalar_lea.vmem %s2583_s1, %s1281_s26  ;;  %v1838_v45 = vpack.c.bf16 %v1332_v41, %v1331_v40  ;;  %v1333_v48 = vld [vmem:[%s2584_s2 + $0x1d0] sm:$0xff]  ;;  %v1334_v49 = vld [vmem:[%s2584_s2 + $0x1d8] sm:$0xff]  ;;  %v1769_v53 = vpack.c.bf16 %v472_v47, %v471_v46  ;;  %vm426_vm6 = vmand %vm422_vm3, %vm424_vm4 }
  0x13   : > { %v412_v28 = vld [vmem:[%s377_s24] sm:$0xff]  ;;  %v1841_v54 = vpack.c.bf16 %v1334_v49, %v1333_v48  ;;  %v474_v56 = vld [vmem:[%s2584_s2 + $0x68] sm:$0xff]  ;;  %v475_v1 = vld [vmem:[%s2584_s2 + $0x70] sm:$0xff]  ;;  %s2608_s25 = smov (!%p392_p7, %s391_s25), 3 }
  0x14   : > { %1761 = vmatpush3.bf16.msra.mxu1 %v1760_v20  ;;  %v413_v31 = vld [vmem:[%s386_s14] sm:$0x3f]  ;;  %v434_v37 = vmul.f32 %v1287_v33, %v412_v28  ;;  %v1336_v58 = vld [vmem:[%s2584_s2 + $0x1e8] sm:$0xff]  ;;  %v476_v2 = vld [vmem:[%s2584_s2 + $0x78] sm:$0xff]  ;;  %s1283_s19 = sshll.u32 %s2608_s25, 3  ;;  %s402_s23 = scalar_lea.vmem %s2589_s7, %s2608_s25 }
  0x15   : > { %1833 = vmatpush3.bf16.msra.mxu0 %v1832_v22  ;;  %1762 = vmatprep.subr.bf16.mxu1 %v2016_v4  ;;  %v435_v38 = vmul.f32 %v1287_v33, %v413_v31  ;;  %v473_v55 = vld [vmem:[%s2584_s2 + $0x60] sm:$0xff]  ;;  %v1337_v5 = vld [vmem:[%s2584_s2 + $0x1f0] sm:$0xff]  ;;  %v1338_v6 = vld [vmem:[%s2584_s2 + $0x1f8] sm:$0xff]  ;;  %v1775_v9 = vpack.c.bf16 %v476_v2, %v475_v1  ;;  %s395_s22 = scalar_lea.vmem %s2588_s6, %s1283_s19  ;;  %s409_s12 = scalar_lea.vmem %s2590_s8, %s2608_s25 }
  0x16   : > { %1834 = vmatprep.subr.bf16.mxu0 %v2016_v4  ;;  %v2186_v42 = vadd.f32 %v1288_v39, %v434_v37  ;;  %v1335_v57 = vld [vmem:[%s2584_s2 + $0x1e0] sm:$0xff]  ;;  %v1772_v61 = vpack.c.bf16 %v474_v56, %v473_v55  ;;  %v1847_v11 = vpack.c.bf16 %v1338_v6, %v1337_v5  ;;  %v1292_v14 = vld [vmem:[%s2584_s2 + $0x88] sm:$0xff]  ;;  %v1293_v22 = vld [vmem:[%s2584_s2 + $0x90] sm:$0xff] }
  0x17   : > { %v444_v43 = vadd.f32 %v1288_v39, %v435_v38  ;;  %v1844_v0 = vpack.c.bf16 %v1336_v58, %v1335_v57  ;;  %v1291_v13 = vld [vmem:[%s2584_s2 + $0x80] sm:$0xff]  ;;  %v1340_v18 = vld [vmem:[%s2584_s2 + $0x208] sm:$0xff]  ;;  %v1294_v23 = vld [vmem:[%s2584_s2 + $0x98] sm:$0xff] }
  0x18   : > { %1764 = vmatpush3.bf16.msra.mxu1 %v1763_v29  ;;  %v445_v51 = vmax.f32 %v2186_v42, 0.0  ;;  %v1339_v17 = vld [vmem:[%s2584_s2 + $0x200] sm:$0xff]  ;;  %v1778_v19 = vpack.c.bf16 %v1292_v14, %v1291_v13  ;;  %v1341_v24 = vld [vmem:[%s2584_s2 + $0x210] sm:$0xff]  ;;  %v1342_v25 = vld [vmem:[%s2584_s2 + $0x218] sm:$0xff]  ;;  %v1781_v26 = vpack.c.bf16 %v1294_v23, %v1293_v22 }
  0x19   : > { %1836 = vmatpush3.bf16.msra.mxu0 %v1835_v30  ;;  %1765 = vmatprep.subr.bf16.mxu1 %v2016_v4  ;;  %v446_v52 = vmax.f32 %v444_v43, 0.0  ;;  %v1850_v21 = vpack.c.bf16 %v1340_v18, %v1339_v17  ;;  %v1853_v27 = vpack.c.bf16 %v1342_v25, %v1341_v24  ;;  %v1295_v28 = vld [vmem:[%s2584_s2 + $0xa0] sm:$0xff]  ;;  %v1296_v29 = vld [vmem:[%s2584_s2 + $0xa8] sm:$0xff]  ;;  %v1297_v34 = vld [vmem:[%s2584_s2 + $0xb0] sm:$0xff] }
  0x1a   : > { %1837 = vmatprep.subr.bf16.mxu0 %v2016_v4  ;;  %v2223_v59 = vsel %vm2202_vm5, %v445_v51, 0.0  ;;  %v1343_v30 = vld [vmem:[%s2584_s2 + $0x220] sm:$0xff]  ;;  %v1344_v31 = vld [vmem:[%s2584_s2 + $0x228] sm:$0xff]  ;;  %v1784_v32 = vpack.c.bf16 %v1296_v29, %v1295_v28  ;;  %v1298_v35 = vld [vmem:[%s2584_s2 + $0xb8] sm:$0xff] }
  0x1b   : > { %v2225_v60 = vsel %vm426_vm6, %v446_v52, 0.0  ;;  %v940_v62 = vrot.slane %v2223_v59, 5  ;;  %v1033_v3 = vrot.slane %v2223_v59, 6  ;;  %v754_v15 = vrot.slane %v2223_v59, 3  ;;  %v1345_v36 = vld [vmem:[%s2584_s2 + $0x230] sm:$0xff]  ;;  %v1346_v37 = vld [vmem:[%s2584_s2 + $0x238] sm:$0xff] }
  0x1c   : > { %1767 = vmatpush3.bf16.msra.mxu1 %v1766_v44  ;;  %v941_v63 = vrot.slane %v2225_v60, 5  ;;  %v1034_v8 = vrot.slane %v2225_v60, 6  ;;  %v755_v16 = vrot.slane %v2225_v60, 3  ;;  %v1856_v33 = vpack.c.bf16 %v1344_v31, %v1343_v30  ;;  %v1299_v40 = vld [vmem:[%s2584_s2 + $0xc0] sm:$0xff]  ;;  %v1300_v41 = vld [vmem:[%s2584_s2 + $0xc8] sm:$0xff]  ;;  %v1301_v46 = vld [vmem:[%s2584_s2 + $0xd0] sm:$0xff] }
  0x1d   : > { %1839 = vmatpush3.bf16.msra.mxu0 %v1838_v45  ;;  %1768 = vmatprep.subr.bf16.mxu1 %v2016_v4  ;;  %v1787_v38 = vpack.c.bf16 %v1298_v35, %v1297_v34  ;;  %v1859_v39 = vpack.c.bf16 %v1346_v37, %v1345_v36  ;;  %v1347_v42 = vld [vmem:[%s2584_s2 + $0x240] sm:$0xff]  ;;  %v1348_v43 = vld [vmem:[%s2584_s2 + $0x248] sm:$0xff]  ;;  %v1790_v44 = vpack.c.bf16 %v1300_v41, %v1299_v40  ;;  %v1302_v47 = vld [vmem:[%s2584_s2 + $0xd8] sm:$0xff]  ;;  %v568_v1 = vrot.slane %v2223_v59, 1 }
  0x1e   : > { %1840 = vmatprep.subr.bf16.mxu0 %v2016_v4  ;;  %v2244_v7 = vsel %vm939_vm7, %v940_v62, %v941_v63  ;;  %v2247_v10 = vsel %vm1032_vm8, %v1033_v3, %v1034_v8  ;;  %v756_v20 = vsel %vm753_vm9, %v754_v15, %v755_v16  ;;  %v1862_v45 = vpack.c.bf16 %v1348_v43, %v1347_v42  ;;  %v1349_v48 = vld [vmem:[%s2584_s2 + $0x250] sm:$0xff]  ;;  %v1350_v49 = vld [vmem:[%s2584_s2 + $0x258] sm:$0xff]  ;;  %v1303_v52 = vld [vmem:[%s2584_s2 + $0xe0] sm:$0xff] }
  0x1f   : > { %v1793_v50 = vpack.c.bf16 %v1302_v47, %v1301_v46  ;;  %v1352_v55 = vld [vmem:[%s2584_s2 + $0x268] sm:$0xff]  ;;  %v1305_v58 = vld [vmem:[%s2584_s2 + $0xf0] sm:$0xff]  ;;  %v1354_v63 = vld [vmem:[%s2584_s2 + $0x278] sm:$0xff]  ;;  %v569_v2 = vrot.slane %v2225_v60, 1  ;;  %v847_v8 = vrot.slane %v2223_v59, 4 }
  0x20   : > { %1770 = vmatpush3.bf16.msra.mxu1 %v1769_v53  ;;  %v1304_v53 = vld [vmem:[%s2584_s2 + $0xe8] sm:$0xff]  ;;  %v1353_v62 = vld [vmem:[%s2584_s2 + $0x270] sm:$0xff]  ;;  %v1307_v5 = vld [vmem:[%s2584_s2 + $0x100] sm:$0xff] }
  0x21   : > { %1842 = vmatpush3.bf16.msra.mxu0 %v1841_v54  ;;  %1771 = vmatprep.subr.bf16.mxu1 %v2016_v4  ;;  %v1351_v54 = vld [vmem:[%s2584_s2 + $0x260] sm:$0xff]  ;;  %v1796_v56 = vpack.c.bf16 %v1304_v53, %v1303_v52  ;;  %v1871_v3 = vpack.c.bf16 %v1354_v63, %v1353_v62  ;;  %v1308_v6 = vld [vmem:[%s2584_s2 + $0x108] sm:$0xff]  ;;  %v570_v14 = vsel %vm567_vm10, %v568_v1, %v569_v2  ;;  %v1309_v18 = vld [vmem:[%s2584_s2 + $0x110] sm:$0xff]  ;;  %v662_v62 = vrot.slane %v2225_v60, 2 }
  0x22   : > { %1843 = vmatprep.subr.bf16.mxu0 %v2016_v4  ;;  %v1868_v57 = vpack.c.bf16 %v1352_v55, %v1351_v54  ;;  %v1356_v13 = vld [vmem:[%s2584_s2 + $0x288] sm:$0xff]  ;;  %v1802_v15 = vpack.c.bf16 %v1308_v6, %v1307_v5  ;;  %v1311_v24 = vld [vmem:[%s2584_s2 + $0x120] sm:$0xff]  ;;  %v1313_v30 = vld [vmem:[%s2584_s2 + $0x130] sm:$0xff] }
  0x23   : > { %v1312_v25 = vld [vmem:[%s2584_s2 + $0x128] sm:$0xff]  ;;  %v1314_v31 = vld [vmem:[%s2584_s2 + $0x138] sm:$0xff]  ;;  %v1315_v36 = vld [vmem:[%s2584_s2 + $0x140] sm:$0xff] }
  0x24   : > { %1773 = vmatpush3.bf16.msra.mxu1 %v1772_v61  ;;  %v1306_v61 = vld [vmem:[%s2584_s2 + $0xf8] sm:$0xff]  ;;  %v1808_v28 = vpack.c.bf16 %v1312_v25, %v1311_v24  ;;  %v1811_v34 = vpack.c.bf16 %v1314_v31, %v1313_v30  ;;  %v1316_v37 = vld [vmem:[%s2584_s2 + $0x148] sm:$0xff]  ;;  %v1317_v42 = vld [vmem:[%s2584_s2 + $0x150] sm:$0xff] }
  0x25   : > { %1845 = vmatpush3.bf16.msra.mxu0 %v1844_v0  ;;  %1774 = vmatprep.subr.bf16.mxu1 %v2016_v4  ;;  %v1799_v0 = vpack.c.bf16 %v1306_v61, %v1305_v58  ;;  %v1814_v40 = vpack.c.bf16 %v1316_v37, %v1315_v36  ;;  %v1318_v43 = vld [vmem:[%s2584_s2 + $0x158] sm:$0xff]  ;;  %v1321_v54 = vld [vmem:[%s2584_s2 + $0x170] sm:$0xff]  ;;  %v661_v61 = vrot.slane %v2223_v59, 2  ;;  %v1372_v1 = vld [vmem:[%s2584_s2 + $0x308] sm:$0xff] }
  0x26   : > { %1846 = vmatprep.subr.bf16.mxu0 %v2016_v4  ;;  %v1817_v46 = vpack.c.bf16 %v1318_v43, %v1317_v42  ;;  %v1322_v55 = vld [vmem:[%s2584_s2 + $0x178] sm:$0xff]  ;;  %v1375_v6 = vld [vmem:[%s2584_s2 + $0x320] sm:$0xff] }
  0x27   : > { %v1823_v58 = vpack.c.bf16 %v1322_v55, %v1321_v54  ;;  %v663_v2 = vsel %vm660_vm12, %v661_v61, %v662_v62 }
  0x28   : > { %1776 = vmatpush3.bf16.msra.mxu1 %v1775_v9  ;;  %v848_v9 = vrot.slane %v2225_v60, 4  ;;  %v1373_v60 = vld [vmem:[%s2584_s2 + $0x310] sm:$0xff] }
  0x29   : > { %1848 = vmatpush3.bf16.msra.mxu0 %v1847_v11  ;;  %1777 = vmatprep.subr.bf16.mxu1 %v2016_v4  ;;  %v1355_v11 = vld [vmem:[%s2584_s2 + $0x280] sm:$0xff] }
  0x2a   : > { %1849 = vmatprep.subr.bf16.mxu0 %v2016_v4  ;;  %v849_v16 = vsel %vm846_vm11, %v847_v8, %v848_v9  ;;  %v1874_v17 = vpack.c.bf16 %v1356_v13, %v1355_v11  ;;  %v1376_v8 = vld [vmem:[%s2584_s2 + $0x328] sm:$0xff]  ;;  %v1379_v13 = vld [vmem:[%s2584_s2 + $0x340] sm:$0xff] }
  0x2b   : > { %1541 = vmatmul.mubr.msk.f32.vlgmr.msra.gmra.mrb[0].mxu1 %vm2202_vm5, %v445_v51  ;;  %v1865_v51 = vpack.c.bf16 %v1350_v49, %v1349_v48  ;;  %v1319_v48 = vld [vmem:[%s2584_s2 + $0x160] sm:$0xff]  ;;  %v1320_v49 = vld [vmem:[%s2584_s2 + $0x168] sm:$0xff]  ;;  %v1904_v9 = vpack.c.bf16 %v1376_v8, %v1375_v6 }
  0x2c   : > { %1779 = vmatpush3.bf16.msra.mxu1 %v1778_v19  ;;  %1646 = vmatmul.mubr.f32.vlgmr.msra.gmra.mrb[0].mxu0 %v756_v20  ;;  %v1310_v19 = vld [vmem:[%s2584_s2 + $0x118] sm:$0xff]  ;;  %v1357_v20 = vld [vmem:[%s2584_s2 + $0x290] sm:$0xff]  ;;  %v1820_v52 = vpack.c.bf16 %v1320_v49, %v1319_v48 }
  0x2d   : > { %1851 = vmatpush3.bf16.msra.mxu0 %v1850_v21  ;;  %1780 = vmatprep.subr.bf16.mxu1 %v2016_v4  ;;  %v1358_v21 = vld [vmem:[%s2584_s2 + $0x298] sm:$0xff]  ;;  %v1805_v22 = vpack.c.bf16 %v1310_v19, %v1309_v18  ;;  %v1383_v19 = vld [vmem:[%s2584_s2 + $0x360] sm:$0xff] }
  0x2e   : > { %1852 = vmatprep.subr.bf16.mxu0 %v2016_v4  ;;  %1575 = vmatprep.mubr.msk.f32.mxu1 %vm2017_vm0, %v2018_v12  ;;  %v1877_v23 = vpack.c.bf16 %v1358_v21, %v1357_v20  ;;  %v1384_v20 = vld [vmem:[%s2584_s2 + $0x368] sm:$0xff] }
  0x2f   : > { %1680 = vmatprep.mubr.msk.f32.mxu0 %vm2017_vm0, %v2018_v12  ;;  %v1916_v21 = vpack.c.bf16 %v1384_v20, %v1383_v19 }
  0x30   : > { %1782 = vmatpush3.bf16.msra.mxu1 %v1781_v26  ;;  %v1359_v26 = vld [vmem:[%s2584_s2 + $0x2a0] sm:$0xff] }
  0x31   : > { %1854 = vmatpush3.bf16.msra.mxu0 %v1853_v27  ;;  %1783 = vmatprep.subr.bf16.mxu1 %v2016_v4  ;;  %v1360_v27 = vld [vmem:[%s2584_s2 + $0x2a8] sm:$0xff] }
  0x32   : > { %1855 = vmatprep.subr.bf16.mxu0 %v2016_v4  ;;  %v1880_v29 = vpack.c.bf16 %v1360_v27, %v1359_v26  ;;  %v1289_v27 = vld [vmem:[%s2585_s3] ss:$0 sm:$0xff] }
  0x34   : > { %1785 = vmatpush3.bf16.msra.mxu1 %v1784_v32  ;;  %v1361_v32 = vld [vmem:[%s2584_s2 + $0x2b0] sm:$0xff] }
  0x35   : > { %1857 = vmatpush3.bf16.msra.mxu0 %v1856_v33  ;;  %1786 = vmatprep.subr.bf16.mxu1 %v2016_v4  ;;  %v1362_v33 = vld [vmem:[%s2584_s2 + $0x2b8] sm:$0xff] }
  0x36   : > { %1858 = vmatprep.subr.bf16.mxu0 %v2016_v4  ;;  %v1883_v35 = vpack.c.bf16 %v1362_v33, %v1361_v32 }
  0x38   : > { %1788 = vmatpush3.bf16.msra.mxu1 %v1787_v38  ;;  %v1363_v38 = vld [vmem:[%s2584_s2 + $0x2c0] sm:$0xff] }
  0x39   : > { %1860 = vmatpush3.bf16.msra.mxu0 %v1859_v39  ;;  %1789 = vmatprep.subr.bf16.mxu1 %v2016_v4  ;;  %v1364_v39 = vld [vmem:[%s2584_s2 + $0x2c8] sm:$0xff] }
  0x3a   : > { %1861 = vmatprep.subr.bf16.mxu0 %v2016_v4  ;;  %v1886_v41 = vpack.c.bf16 %v1364_v39, %v1363_v38 }
  0x3c   : > { %1791 = vmatpush3.bf16.msra.mxu1 %v1790_v44  ;;  %v1365_v44 = vld [vmem:[%s2584_s2 + $0x2d0] sm:$0xff] }
  0x3d   : > { %1863 = vmatpush3.bf16.msra.mxu0 %v1862_v45  ;;  %1792 = vmatprep.subr.bf16.mxu1 %v2016_v4  ;;  %v1366_v45 = vld [vmem:[%s2584_s2 + $0x2d8] sm:$0xff] }
  0x3e   : > { %1864 = vmatprep.subr.bf16.mxu0 %v2016_v4  ;;  %v1889_v47 = vpack.c.bf16 %v1366_v45, %v1365_v44 }
  0x40   : > { %1794 = vmatpush3.bf16.msra.mxu1 %v1793_v50  ;;  %v1367_v50 = vld [vmem:[%s2584_s2 + $0x2e0] sm:$0xff] }
  0x41   : > { %1866 = vmatpush3.bf16.msra.mxu0 %v1865_v51  ;;  %1795 = vmatprep.subr.bf16.mxu1 %v2016_v4  ;;  %v1368_v51 = vld [vmem:[%s2584_s2 + $0x2e8] sm:$0xff] }
  0x42   : > { %1867 = vmatprep.subr.bf16.mxu0 %v2016_v4  ;;  %v1892_v53 = vpack.c.bf16 %v1368_v51, %v1367_v50 }
  0x44   : > { %1797 = vmatpush3.bf16.msra.mxu1 %v1796_v56  ;;  %v1369_v56 = vld [vmem:[%s2584_s2 + $0x2f0] sm:$0xff] }
  0x45   : > { %1869 = vmatpush3.bf16.msra.mxu0 %v1868_v57  ;;  %1798 = vmatprep.subr.bf16.mxu1 %v2016_v4  ;;  %v1370_v57 = vld [vmem:[%s2584_s2 + $0x2f8] sm:$0xff] }
  0x46   : > { %1870 = vmatprep.subr.bf16.mxu0 %v2016_v4  ;;  %v1895_v63 = vpack.c.bf16 %v1370_v57, %v1369_v56 }
  0x48   : > { %1800 = vmatpush3.bf16.msra.mxu1 %v1799_v0  ;;  %v1371_v0 = vld [vmem:[%s2584_s2 + $0x300] sm:$0xff] }
  0x49   : > { %1872 = vmatpush3.bf16.msra.mxu0 %v1871_v3  ;;  %1801 = vmatprep.subr.bf16.mxu1 %v2016_v4  ;;  %v1898_v59 = vpack.c.bf16 %v1372_v1, %v1371_v0  ;;  %v1374_v3 = vld [vmem:[%s2584_s2 + $0x318] sm:$0xff] }
  0x4a   : > { %1873 = vmatprep.subr.bf16.mxu0 %v2016_v4  ;;  %v1901_v5 = vpack.c.bf16 %v1374_v3, %v1373_v60 }
  0x4b   : > { %1576 = vmatmul.mubr.f32.vlgmr.msra.gmra.mrb[0].mxu1 %v570_v14  ;;  %v1380_v14 = vld [vmem:[%s2584_s2 + $0x348] sm:$0xff] }
  0x4c   : > { %1803 = vmatpush3.bf16.msra.mxu1 %v1802_v15  ;;  %1681 = vmatmul.mubr.f32.vlgmr.msra.gmra.mrb[0].mxu0 %v849_v16  ;;  %v1910_v15 = vpack.c.bf16 %v1380_v14, %v1379_v13  ;;  %v1381_v16 = vld [vmem:[%s2584_s2 + $0x350] sm:$0xff] }
  0x4d   : > { %1875 = vmatpush3.bf16.msra.mxu0 %v1874_v17  ;;  %1804 = vmatprep.subr.bf16.mxu1 %v2016_v4  ;;  %v1382_v17 = vld [vmem:[%s2584_s2 + $0x358] sm:$0xff] }
  0x4e   : > { %1876 = vmatprep.subr.bf16.mxu0 %v2016_v4  ;;  %1610 = vmatprep.mubr.msk.f32.mxu1 %vm2017_vm0, %v2018_v12  ;;  %v1913_v18 = vpack.c.bf16 %v1382_v17, %v1381_v16 }
  0x4f   : > { %1715 = vmatprep.mubr.msk.f32.mxu0 %vm2017_vm0, %v2018_v12 }
  0x50   : > { %1806 = vmatpush3.bf16.msra.mxu1 %v1805_v22  ;;  %v1385_v22 = vld [vmem:[%s2584_s2 + $0x370] sm:$0xff] }
  0x51   : > { %1878 = vmatpush3.bf16.msra.mxu0 %v1877_v23  ;;  %1807 = vmatprep.subr.bf16.mxu1 %v2016_v4  ;;  %v1386_v23 = vld [vmem:[%s2584_s2 + $0x378] sm:$0xff] }
  0x52   : > { %1879 = vmatprep.subr.bf16.mxu0 %v2016_v4  ;;  %v1919_v24 = vpack.c.bf16 %v1386_v23, %v1385_v22 }
  0x54   : > { %1809 = vmatpush3.bf16.msra.mxu1 %v1808_v28 }
  0x55   : > { %1881 = vmatpush3.bf16.msra.mxu0 %v1880_v29  ;;  %1810 = vmatprep.subr.bf16.mxu1 %v2016_v4 }
  0x56   : > { %1882 = vmatprep.subr.bf16.mxu0 %v2016_v4 }
  0x58   : > { %1812 = vmatpush3.bf16.msra.mxu1 %v1811_v34 }
  0x59   : > { %1884 = vmatpush3.bf16.msra.mxu0 %v1883_v35  ;;  %1813 = vmatprep.subr.bf16.mxu1 %v2016_v4 }
  0x5a   : > { %1885 = vmatprep.subr.bf16.mxu0 %v2016_v4 }
  0x5c   : > { %1815 = vmatpush3.bf16.msra.mxu1 %v1814_v40 }
  0x5d   : > { %1887 = vmatpush3.bf16.msra.mxu0 %v1886_v41  ;;  %1816 = vmatprep.subr.bf16.mxu1 %v2016_v4 }
  0x5e   : > { %1888 = vmatprep.subr.bf16.mxu0 %v2016_v4 }
  0x60   : > { %1818 = vmatpush3.bf16.msra.mxu1 %v1817_v46 }
  0x61   : > { %1890 = vmatpush3.bf16.msra.mxu0 %v1889_v47  ;;  %1819 = vmatprep.subr.bf16.mxu1 %v2016_v4 }
  0x62   : > { %1891 = vmatprep.subr.bf16.mxu0 %v2016_v4 }
  0x64   : > { %1821 = vmatpush3.bf16.msra.mxu1 %v1820_v52 }
  0x65   : > { %1893 = vmatpush3.bf16.msra.mxu0 %v1892_v53  ;;  %1822 = vmatprep.subr.bf16.mxu1 %v2016_v4 }
  0x66   : > { %1894 = vmatprep.subr.bf16.mxu0 %v2016_v4 }
  0x68   : > { %1824 = vmatpush3.bf16.msra.mxu1 %v1823_v58 }
  0x69   : > { %1896 = vmatpush3.bf16.msra.mxu0 %v1895_v63 }
  0x6a   : > { %1897 = vmatprep.subr.bf16.mxu0 %v2016_v4 }
  0x6b   : > { %1611 = vmatmul.mubr.f32.vlgmr.msra.gmra.mrb[0].mxu1 %v663_v2 }
  0x6c   : > { %1716 = vmatmul.mubr.f32.vlgmr.msra.gmra.mrb[0].mxu0 %v2244_v7  ;;  %v1377_v7 = vld [vmem:[%s2584_s2 + $0x330] sm:$0xff] }
  0x6d   : > { %1899 = vmatpush3.bf16.msra.mxu0 %v1898_v59  ;;  %1750 = vmatprep.mubr.msk.f32.mxu0 %vm2017_vm0, %v2018_v12  ;;  %v1378_v12 = vld [vmem:[%s2584_s2 + $0x338] sm:$0xff] }
  0x6e   : > { %1900 = vmatprep.subr.bf16.mxu0 %v2016_v4  ;;  %v1907_v11 = vpack.c.bf16 %v1378_v12, %v1377_v7 }
  0x71   : > { %1902 = vmatpush3.bf16.msra.mxu0 %v1901_v5 }
  0x72   : > { %1903 = vmatprep.subr.bf16.mxu0 %v2016_v4 }
  0x75   : > { %1905 = vmatpush3.bf16.msra.mxu0 %v1904_v9 }
  0x76   : > { %1906 = vmatprep.subr.bf16.mxu0 %v2016_v4 }
  0x79   : > { %1908 = vmatpush3.bf16.msra.mxu0 %v1907_v11 }
  0x7a   : > { %1909 = vmatprep.subr.bf16.mxu0 %v2016_v4 }
  0x7d   : > { %1911 = vmatpush3.bf16.msra.mxu0 %v1910_v15 }
  0x7e   : > { %1912 = vmatprep.subr.bf16.mxu0 %v2016_v4 }
  0x81   : > { %1914 = vmatpush3.bf16.msra.mxu0 %v1913_v18 }
  0x82   : > { %1915 = vmatprep.subr.bf16.mxu0 %v2016_v4 }
  0x85   : > { %1917 = vmatpush3.bf16.msra.mxu0 %v1916_v21 }
  0x86   : > { %1918 = vmatprep.subr.bf16.mxu0 %v2016_v4 }
  0x89   : > { %1920 = vmatpush3.bf16.msra.mxu0 %v1919_v24 }
  0x8c   : > { %1751 = vmatmul.mubr.f32.vlgmr.msra.gmra.mrb[0].mxu0 %v2247_v10 }
 0x13e   : > { %v731_v25 = vpop.f32.mrb[0].mxu1 }
 0x13f   : > { %v1612_v26 = vpop.f32.mrb[1].mxu1  ;;  %v1921_v28 = vadd.f32 %v1289_v27, %v731_v25 }
 0x15f   : > { %v1103_v4 = vpop.f32.mrb[0].mxu0 }
 0x160   : > { %v1922_v29 = vadd.f32 %v1921_v28, %v1103_v4  ;;  %v1752_v30 = vpop.f32.mrb[1].mxu0 }
 0x162   : > { %1108 = vst [vmem:[%s395_s22] sm:$0xff] %v1922_v29  ;;  %v1109_v10 = vrot.slane %v1922_v29, 4  ;;  %v1116_v31 = vmul.f32 %v1922_v29, %v1922_v29 }
 0x164   : > { %v1110_v32 = vadd.f32 %v1922_v29, %v1109_v10  ;;  %v1117_v33 = vrot.slane %v1116_v31, 4 }
 0x166   : > { %v1111_v34 = vrot.slane %v1110_v32, 2  ;;  %v1118_v35 = vadd.f32 %v1117_v33, %v1116_v31 }
 0x168   : > { %v1112_v36 = vadd.f32 %v1111_v34, %v1110_v32  ;;  %v1119_v37 = vrot.slane %v1118_v35, 2 }
 0x16a   : > { %v1113_v38 = vrot.slane %v1112_v36, 1  ;;  %v1120_v39 = vadd.f32 %v1119_v37, %v1118_v35 }
 0x16c   : > { %v1114_v40 = vadd.f32 %v1113_v38, %v1112_v36  ;;  %v1121_v41 = vrot.slane %v1120_v39, 1 }
 0x16e   : > { %1115 = vst [vmem:[%s402_s23] sm:$0x1] %v1114_v40  ;;  %v1122_v42 = vadd.f32 %v1121_v41, %v1120_v39 }
 0x170   : > { %1123 = vst [vmem:[%s409_s12] sm:$0x1] %v1122_v42 }
 0x171 PF: > { %s19_s9 = sadd.s32 1, %s2014_s9   ;;  %s2593_s27 = smov %s2006_s29 }
 0x172   : > { %p16_p8 = scmp.ge.s32.totalorder %s19_s9, 6   ;;  %s2594_s28 = smov %s2010_s30 }
 0x173   : > { %s2595_s29 = smov %s2598_s10  ;;  %s2596_s30 = smov %s2602_s11 }
 0x174   :  { %18 = sbr.rel (!%p16_p8) target bundleno = 3 (0x3), region = 107 }

// kernel: _lambda_.7
= control target key start
LH: loop header
LB: loop body
LE: loop exit
PB: predicated region body
PF: predicated region fallthrough
CT: control target
= control target key end

     0   :  { %s172_s0 = inlined_call_operand.vmem [shape: f32[32,128], index: 0, kind: input, shape index: {}]   ;;  %s173_s1 = inlined_call_operand.vmem [shape: f32[1,128], index: 1, kind: input, shape index: {}]   ;;  %s174_s2 = inlined_call_operand.vmem [shape: f32[1,128], index: 2, kind: input, shape index: {}]   ;;  %s175_s3 = inlined_call_operand.vmem [shape: f32[32,128], index: 3, kind: input, shape index: {}, may-alias: {3,4}]   ;;  %s176_s4 = inlined_call_operand.vmem [shape: f32[32,128], index: 4, kind: output, shape index: {}, may-alias: {3,4}]  }
   0x1   :  { %v21_v0 = vld [vmem:[%s172_s0] sm:$0xff]  ;;  %v22_v4 = vld [vmem:[%s172_s0 + $0x8] sm:$0xff]  ;;  %v23_v6 = vld [vmem:[%s172_s0 + $0x10] sm:$0xff] }
   0x2   :  { %v83_v1 = vld [vmem:[%s173_s1] ss:$0 sm:$0xff]  ;;  %v24_v9 = vld [vmem:[%s172_s0 + $0x18] sm:$0xff]  ;;  %v18_v27 = vld [vmem:[%s175_s3 + $0x8] sm:$0xff] }
   0x3   :  { %v32_v2 = vmul.f32 %v83_v1, %v21_v0  ;;  %v84_v3 = vld [vmem:[%s174_s2] ss:$0 sm:$0xff]  ;;  %v33_v5 = vmul.f32 %v83_v1, %v22_v4  ;;  %v34_v8 = vmul.f32 %v83_v1, %v23_v6  ;;  %v35_v11 = vmul.f32 %v83_v1, %v24_v9  ;;  %v19_v29 = vld [vmem:[%s175_s3 + $0x10] sm:$0xff]  ;;  %v20_v32 = vld [vmem:[%s175_s3 + $0x18] sm:$0xff] }
   0x4   :  { %v17_v26 = vld [vmem:[%s175_s3] sm:$0xff] }
   0x5   :  { %v43_v7 = vadd.f32 %v84_v3, %v32_v2  ;;  %v44_v10 = vadd.f32 %v84_v3, %v33_v5  ;;  %v45_v13 = vadd.f32 %v84_v3, %v34_v8  ;;  %v46_v15 = vadd.f32 %v84_v3, %v35_v11 }
   0x7   :  { %v85_v12 = vmul.f32 -1.442695, %v43_v7  ;;  %v86_v14 = vmul.f32 -1.442695, %v44_v10  ;;  %v87_v16 = vmul.f32 -1.442695, %v45_v13 }
   0x8   :  { %v88_v17 = vmul.f32 -1.442695, %v46_v15 }
   0x9   :  { %89 = vpow2.f32 %v85_v12 }
   0xa   :  { %91 = vpow2.f32 %v86_v14 }
   0xb   :  { %93 = vpow2.f32 %v87_v16 }
   0xc   :  { %95 = vpow2.f32 %v88_v17 }
  0x13   :  { %v90_v18 = vpop.eup %89 }
  0x14   :  { %v92_v19 = vpop.eup %91  ;;  %v59_v20 = vadd.f32 1.0, %v90_v18 }
  0x15   :  { %v94_v21 = vpop.eup %93  ;;  %v60_v22 = vadd.f32 1.0, %v92_v19 }
  0x16   :  { %v96_v23 = vpop.eup %95  ;;  %97 = vrcp.f32 %v59_v20  ;;  %v61_v24 = vadd.f32 1.0, %v94_v21 }
  0x17   :  { %99 = vrcp.f32 %v60_v22  ;;  %v62_v25 = vadd.f32 1.0, %v96_v23 }
  0x18   :  { %101 = vrcp.f32 %v61_v24 }
  0x19   :  { %103 = vrcp.f32 %v62_v25 }
  0x20   :  { %v98_v28 = vpop.eup %97 }
  0x21   :  { %v100_v30 = vpop.eup %99  ;;  %v71_v31 = vmul.f32 %v98_v28, %v17_v26 }
  0x22   :  { %v102_v33 = vpop.eup %101  ;;  %v72_v34 = vmul.f32 %v100_v30, %v18_v27 }
  0x23   :  { %v104_v35 = vpop.eup %103  ;;  %75 = vst [vmem:[%s176_s4] sm:$0xff] %v71_v31  ;;  %v73_v36 = vmul.f32 %v102_v33, %v19_v29 }
  0x24   :  { %76 = vst [vmem:[%s176_s4 + $0x8] sm:$0xff] %v72_v34  ;;  %v74_v37 = vmul.f32 %v104_v35, %v20_v32 }
  0x25   :  { %77 = vst [vmem:[%s176_s4 + $0x10] sm:$0xff] %v73_v36 }
  0x26   :  { %78 = vst [vmem:[%s176_s4 + $0x18] sm:$0xff] %v74_v37 }

</bundles_post_ra>
